<compile_context>
chip_gen: v6e
topology: v6e:2x2x1
jax: 0.10.0
libtpu: 0.0.40
codegen_flags: <defaults>
</compile_context>

<pallas_src>
import functools

import jax
import jax.numpy as jnp
import numpy as np
from jax.experimental import pallas as pl
from jax.experimental.pallas import tpu as pltpu


# ------------------------- host-side weight packing ---------------------------
def _pack_blocks(blocks, cols, align=8):
    """Row-concatenate 2-D arrays at 8-sublane-aligned offsets (zero padded)."""
    offsets, row = [], 0
    for a in blocks:
        offsets.append(row)
        row += ((a.shape[0] + align - 1) // align) * align
    packed = np.zeros((max(row, align), cols), np.float32)
    for off, a in zip(offsets, blocks):
        a = np.asarray(a, np.float32)
        packed[off:off + a.shape[0], :a.shape[1]] = a
    return jnp.asarray(packed), offsets


def pack_params(params):
    """Pack all weights into 3 arrays (conv/lstm/mlp) + static slice metadata."""
    conv, lstm, mlp = params["conv"], params["lstm"], params["mlp"]
    assert len(lstm) >= 1
    H = lstm[0][1].shape[0]          # hidden size (== layer_widths)
    Wd = mlp[0][0].shape[1]          # regressor width (== layer_widths)

    conv_meta = []
    if conv:
        cout = conv[0][0].shape[-1]
        blocks = []
        for (w, b) in conv:
            blocks += [w[0], w[1], w[2], b]        # taps x[t-1], x[t], x[t+1], bias
        conv_pack, offs = _pack_blocks(blocks, cout)
        for li, (w, b) in enumerate(conv):
            o = offs[4 * li:4 * li + 4]
            conv_meta.append((int(w.shape[1]), o[0], o[1], o[2], o[3]))
    else:
        conv_pack = jnp.zeros((8, 8), jnp.float32)  # unused dummy

    blocks = []
    for (wih, whh, bias) in lstm:
        blocks += [wih, whh, bias]
    lstm_pack, offs = _pack_blocks(blocks, 4 * H)
    lstm_meta = []
    for li, (wih, whh, bias) in enumerate(lstm):
        o = offs[3 * li:3 * li + 3]
        lstm_meta.append((int(wih.shape[0]), o[0], o[1], o[2]))

    (w1, b1), (w2, b2), (w3, b3) = mlp              # w3/b3 get zero-padded to Wd cols
    mlp_pack, mlp_offs = _pack_blocks([w1, b1, w2, b2, w3, b3], Wd)

    meta = dict(num_conv=len(conv), num_lstm=len(lstm), hidden=H, width=Wd,
                conv=tuple(conv_meta), lstm=tuple(lstm_meta), mlp=tuple(mlp_offs))
    packed = dict(conv=conv_pack, lstm=lstm_pack, mlp=mlp_pack)
    return packed, meta


# ----------------------------- fused forward kernel --------------------------
def _fused_forward_kernel(x_ref, convp_ref, lstmp_ref, mlpp_ref, o_ref, *,
                          meta, seq_len, batch, bpad):
    S, B, BP = seq_len, batch, bpad
    H, Wd = meta["hidden"], meta["width"]
    num_conv, num_lstm = meta["num_conv"], meta["num_lstm"]
    f32 = jnp.float32

    # time-major, batch padded to BP sublanes: rows [t0 b0..b{BP-1}, t1 ...]
    h = x_ref[...]                                               # (S*BP, C)

    # ---- Conv1d(k=3, padding=1) + ReLU stack; halo shifts done in vregs -----
    for li in range(num_conv):
        cin, o0, o1, o2, ob = meta["conv"][li]
        w_m1 = convp_ref[o0:o0 + cin, :]                         # tap for x[t-1]
        w_00 = convp_ref[o1:o1 + cin, :]                         # tap for x[t]
        w_p1 = convp_ref[o2:o2 + cin, :]                         # tap for x[t+1]
        b = convp_ref[ob:ob + 1, :]
        y_m1 = jnp.dot(h, w_m1, preferred_element_type=f32)
        y_00 = jnp.dot(h, w_00, preferred_element_type=f32)
        y_p1 = jnp.dot(h, w_p1, preferred_element_type=f32)
        zblk = jnp.zeros((BP, y_00.shape[-1]), f32)
        y_m1 = jnp.concatenate([zblk, y_m1[:-BP, :]], axis=0)    # t-1 -> t (zero at t=0)
        y_p1 = jnp.concatenate([y_p1[BP:, :], zblk], axis=0)     # t+1 -> t (zero at t=S-1)
        h = jnp.maximum(y_00 + b + y_m1 + y_p1, 0.0)             # (S*BP, cout)

    # ---- multi-layer LSTM, skewed across layers (zero init state) -----------
    lane = jax.lax.broadcasted_iota(jnp.int32, (BP, 4 * H), 1)
    g_lane = (lane >= 2 * H) & (lane < 3 * H)                    # g-gate lanes of [i,f,g,o]
    gmul = jnp.where(g_lane, 2.0, 1.0).astype(f32)               # tanh(x)=2*sigmoid(2x)-1
    goff = jnp.where(g_lane, 1.0, 0.0).astype(f32)

    wih_v, whh_v, bias_v = [], [], []
    for li in range(num_lstm):
        in_sz, oih, ohh, obi = meta["lstm"][li]
        wih_v.append(lstmp_ref[oih:oih + in_sz, :])
        whh_v.append(lstmp_ref[ohh:ohh + H, :])
        bias_v.append(lstmp_ref[obi:obi + 1, :])
    # hoisted per-step bias broadcast for layers >= 1 (layer 0's is folded into gx0)
    bias_b = [jnp.broadcast_to(bias_v[li], (BP, 4 * H)) for li in range(num_lstm)]

    # hoisted layer-0 input projection: one (S*BP, I) x (I, 4H) matmul + bias
    gx0 = jnp.dot(h, wih_v[0], preferred_element_type=f32) + bias_v[0]

    w1_off, b1_off, w2_off, b2_off, w3_off, b3_off = meta["mlp"]

    hs = [jnp.zeros((BP, H), f32) for _ in range(num_lstm)]
    cs = [jnp.zeros((BP, H), f32) for _ in range(num_lstm)]
    out_prev = [None] * num_lstm                # each layer's output at its latest step
    acc = jnp.zeros((BP, Wd), f32)              # regressor W1 partial sums

    for g in range(S + num_lstm - 1):           # skewed schedule: layer li does t = g - li
        snap = list(out_prev)                   # layer outputs from the previous step
        for li in range(num_lstm):
            t = g - li
            if t < 0 or t >= S:
                continue
            if li == 0:
                gin = gx0[t * BP:(t + 1) * BP, :]
            else:                               # per-step input projection (MXU is idle)
                gin = jnp.dot(snap[li - 1], wih_v[li],
                              preferred_element_type=f32) + bias_b[li]
            gates = gin + jnp.dot(hs[li], whh_v[li], preferred_element_type=f32)
            sgm = jax.nn.sigmoid(gates * gmul)  # single EUP pass over (BP, 4H)
            act = sgm * gmul - goff             # -> [sig(i), sig(f), tanh(g), sig(o)]
            i_g = act[:, 0 * H:1 * H]
            f_g = act[:, 1 * H:2 * H]
            g_g = act[:, 2 * H:3 * H]
            o_g = act[:, 3 * H:4 * H]
            c_new = f_g * cs[li] + i_g * g_g
            h_new = o_g * jnp.tanh(c_new)
            cs[li], hs[li], out_prev[li] = c_new, h_new, h_new
            if li == num_lstm - 1:              # torch.flatten + W1 folded into recurrence
                w1_blk = mlpp_ref[w1_off + t * H:w1_off + (t + 1) * H, :]
                acc = acc + jnp.dot(h_new, w1_blk, preferred_element_type=f32)

    # ---- regressor tail ------------------------------------------------------
    z1 = jnp.maximum(acc + mlpp_ref[b1_off:b1_off + 1, :], 0.0)
    z2 = jnp.maximum(
        jnp.dot(z1, mlpp_ref[w2_off:w2_off + Wd, :], preferred_element_type=f32)
        + mlpp_ref[b2_off:b2_off + 1, :], 0.0)
    out = (jnp.dot(z2, mlpp_ref[w3_off:w3_off + Wd, :], preferred_element_type=f32)
           + mlpp_ref[b3_off:b3_off + 1, :])    # (BP, Wd); only column 0 is real
    o_ref[...] = out[:B, 0:1].astype(o_ref.dtype)   # drop batch-pad rows


# ----------------------------- wrapper ---------------------------------------
def make_forward(meta):
    @jax.jit
    def forward(x, packed):
        # x: (B, S, C) float32 -> (B,) float32 (matches the PyTorch module)
        B, S, C = x.shape
        BP = max(8, ((B + 7) // 8) * 8)
        # batch-major -> time-major + pad batch to a full 8-sublane group (XLA side)
        x_tm = jnp.transpose(x, (1, 0, 2)).astype(jnp.float32)
        if BP > B:
            x_tm = jnp.pad(x_tm, ((0, 0), (0, BP - B), (0, 0)))   # pad rows are zero
        x_flat = x_tm.reshape(S * BP, C)

        kern = functools.partial(_fused_forward_kernel, meta=meta,
                                 seq_len=S, batch=B, bpad=BP)
        out = pl.pallas_call(
            kern,
            out_shape=jax.ShapeDtypeStruct((B, 1), jnp.float32),
            compiler_params=pltpu.CompilerParams(
                vmem_limit_bytes=32 * 1024 * 1024),   # explicit headroom (v7x 64 MiB)
        )(x_flat, packed["conv"], packed["lstm"], packed["mlp"])
        return out.reshape(-1)

    return forward


# ----------------------------- pure-JAX reference ----------------------------
def reference_forward(x, params):
    S = x.shape[1]
    h = x
    for (w, b) in params["conv"]:
        xp = jnp.pad(h, ((0, 0), (1, 1), (0, 0)))
        out = (jnp.einsum("bsc,co->bso", xp[:, 0:S], w[0])
               + jnp.einsum("bsc,co->bso", xp[:, 1:S + 1], w[1])
               + jnp.einsum("bsc,co->bso", xp[:, 2:S + 2], w[2])
               + b[None])
        h = jnp.maximum(out, 0.0)
    for (wih, whh, bias) in params["lstm"]:
        B = h.shape[0]
        Hh = whh.shape[0]
        hs = jnp.zeros((B, Hh), jnp.float32)
        cs = jnp.zeros((B, Hh), jnp.float32)
        outs = []
        for t in range(S):
            gates = h[:, t, :] @ wih + hs @ whh + bias
            i_g = jax.nn.sigmoid(gates[:, :Hh])
            f_g = jax.nn.sigmoid(gates[:, Hh:2 * Hh])
            g_g = jnp.tanh(gates[:, 2 * Hh:3 * Hh])
            o_g = jax.nn.sigmoid(gates[:, 3 * Hh:])
            cs = f_g * cs + i_g * g_g
            hs = o_g * jnp.tanh(cs)
            outs.append(hs)
        h = jnp.stack(outs, axis=1)
    flat = h.reshape(h.shape[0], -1)
    (w1, b1), (w2, b2), (w3, b3) = params["mlp"]
    y = jnp.maximum(flat @ w1 + b1, 0.0)
    y = jnp.maximum(y @ w2 + b2, 0.0)
    y = y @ w3 + b3
    return y.reshape(-1)


# ----------------------------- parameter init --------------------------------
def init_params(key, layer_num, layer_widths, input_shape):
    # input_shape = (S, C) as in the PyTorch module (in_channels = input_shape[1])
    S, C = input_shape
    cnn_layer_num = layer_num // 2
    lstm_layer_num = layer_num - cnn_layer_num
    W = layer_widths

    def normal(key, shape, scale=0.1):
        return scale * jax.random.normal(key, shape, jnp.float32)

    keys = iter(jax.random.split(key, 64))
    params = {"conv": [], "lstm": [], "mlp": []}

    in_ch = C
    for _ in range(cnn_layer_num):
        w = normal(next(keys), (3, in_ch, W))         # (taps, Cin, Cout)
        b = normal(next(keys), (1, W))
        params["conv"].append((w, b))
        in_ch = W

    in_sz = in_ch
    for _ in range(lstm_layer_num):
        wih = normal(next(keys), (in_sz, 4 * W))      # x @ W_ih^T
        whh = normal(next(keys), (W, 4 * W))          # h @ W_hh^T
        bias = normal(next(keys), (1, 4 * W))         # b_ih + b_hh combined
        params["lstm"].append((wih, whh, bias))
        in_sz = W

    dense_in = W * S
    params["mlp"].append((normal(next(keys), (dense_in, W)), normal(next(keys), (1, W))))
    params["mlp"].append((normal(next(keys), (W, W)), normal(next(keys), (1, W))))
    params["mlp"].append((normal(next(keys), (W, 1)), normal(next(keys), (1, 1))))
    return params


if __name__ == "__main__":
    # Module config: layer_num=4 -> 2 conv layers + 2 LSTM layers, width=32,
    # activation=ReLU, dropout=0.0 (eval), input_shape=(seq=8, features=4).
    B, S, C, W = 2, 8, 4, 32
    layer_num = 4

    key = jax.random.PRNGKey(0)
    k_param, k_x = jax.random.split(key)
    params = init_params(k_param, layer_num, W, (S, C))
    x = jax.random.normal(k_x, (B, S, C), jnp.float32)

    packed, meta = pack_params(params)            # host-side, once (outside jit)
    fwd = make_forward(meta)

    out = jax.block_until_ready(fwd(x, packed))
    ref = jax.block_until_ready(reference_forward(x, params))

    assert out.shape == (B,), out.shape
    np.testing.assert_allclose(np.asarray(out), np.asarray(ref), rtol=1e-4, atol=1e-4)
    print("KERNEL_OK")
</pallas_src>

<mosaic_0001>
module attributes {stable_mosaic.version = 11 : i64} {
  func.func @_fused_forward_kernel(%arg0: memref<64x4xf32, #tpu.memory_space<vmem>>, %arg1: memref<136x32xf32, #tpu.memory_space<vmem>>, %arg2: memref<144x128xf32, #tpu.memory_space<vmem>>, %arg3: memref<344x32xf32, #tpu.memory_space<vmem>>, %arg4: memref<2x1xf32, #tpu.memory_space<vmem>>) attributes {dimension_semantics = [], scalar_prefetch = 0 : i64, scratch_operands = 0 : i64, tpu.core_type = #tpu.core_type<tc>} {
    %c0 = arith.constant 0 : index
    %c0_0 = arith.constant 0 : index
    %0 = vector.load %arg0[%c0, %c0_0] : memref<64x4xf32, #tpu.memory_space<vmem>>, vector<64x4xf32>
    %c0_1 = arith.constant 0 : index
    %c0_2 = arith.constant 0 : index
    %1 = vector.load %arg1[%c0_1, %c0_2] : memref<136x32xf32, #tpu.memory_space<vmem>>, vector<4x32xf32>
    %c8 = arith.constant 8 : index
    %c0_3 = arith.constant 0 : index
    %2 = vector.load %arg1[%c8, %c0_3] : memref<136x32xf32, #tpu.memory_space<vmem>>, vector<4x32xf32>
    %c16 = arith.constant 16 : index
    %c0_4 = arith.constant 0 : index
    %3 = vector.load %arg1[%c16, %c0_4] : memref<136x32xf32, #tpu.memory_space<vmem>>, vector<4x32xf32>
    %c24 = arith.constant 24 : index
    %c0_5 = arith.constant 0 : index
    %4 = vector.load %arg1[%c24, %c0_5] : memref<136x32xf32, #tpu.memory_space<vmem>>, vector<1x32xf32>
    %cst = arith.constant dense<0.000000e+00> : vector<64x32xf32>
    %5 = tpu.matmul %0, %1, %cst {dimension_numbers = #tpu.dot_dimension_numbers<[1], [0], [0], [1], [0, 0, 1, 1], [], []>} : vector<64x4xf32>, vector<4x32xf32>, vector<64x32xf32> -> vector<64x32xf32>
    %cst_6 = arith.constant dense<0.000000e+00> : vector<64x32xf32>
    %6 = tpu.matmul %0, %2, %cst_6 {dimension_numbers = #tpu.dot_dimension_numbers<[1], [0], [0], [1], [0, 0, 1, 1], [], []>} : vector<64x4xf32>, vector<4x32xf32>, vector<64x32xf32> -> vector<64x32xf32>
    %cst_7 = arith.constant dense<0.000000e+00> : vector<64x32xf32>
    %7 = tpu.matmul %0, %3, %cst_7 {dimension_numbers = #tpu.dot_dimension_numbers<[1], [0], [0], [1], [0, 0, 1, 1], [], []>} : vector<64x4xf32>, vector<4x32xf32>, vector<64x32xf32> -> vector<64x32xf32>
    %cst_8 = arith.constant 0.000000e+00 : f32
    %8 = vector.broadcast %cst_8 : f32 to vector<8x32xf32>
    %9 = vector.extract_strided_slice %5 {offsets = [0, 0], sizes = [56, 32], strides = [1, 1]} : vector<64x32xf32> to vector<56x32xf32>
    %10 = tpu.concatenate %8, %9 in 0 : vector<8x32xf32>, vector<56x32xf32> -> vector<64x32xf32>
    %11 = vector.extract_strided_slice %7 {offsets = [8, 0], sizes = [56, 32], strides = [1, 1]} : vector<64x32xf32> to vector<56x32xf32>
    %12 = tpu.concatenate %11, %8 in 0 : vector<56x32xf32>, vector<8x32xf32> -> vector<64x32xf32>
    %13 = vector.broadcast %4 : vector<1x32xf32> to vector<64x32xf32>
    %14 = arith.addf %6, %13 : vector<64x32xf32>
    %15 = arith.addf %14, %10 : vector<64x32xf32>
    %16 = arith.addf %15, %12 : vector<64x32xf32>
    %cst_9 = arith.constant 0.000000e+00 : f32
    %17 = vector.broadcast %cst_9 : f32 to vector<64x32xf32>
    %18 = arith.maximumf %16, %17 : vector<64x32xf32>
    %c32 = arith.constant 32 : index
    %c0_10 = arith.constant 0 : index
    %19 = vector.load %arg1[%c32, %c0_10] : memref<136x32xf32, #tpu.memory_space<vmem>>, vector<32x32xf32>
    %c64 = arith.constant 64 : index
    %c0_11 = arith.constant 0 : index
    %20 = vector.load %arg1[%c64, %c0_11] : memref<136x32xf32, #tpu.memory_space<vmem>>, vector<32x32xf32>
    %c96 = arith.constant 96 : index
    %c0_12 = arith.constant 0 : index
    %21 = vector.load %arg1[%c96, %c0_12] : memref<136x32xf32, #tpu.memory_space<vmem>>, vector<32x32xf32>
    %c128 = arith.constant 128 : index
    %c0_13 = arith.constant 0 : index
    %22 = vector.load %arg1[%c128, %c0_13] : memref<136x32xf32, #tpu.memory_space<vmem>>, vector<1x32xf32>
    %cst_14 = arith.constant dense<0.000000e+00> : vector<64x32xf32>
    %23 = tpu.matmul %18, %19, %cst_14 {dimension_numbers = #tpu.dot_dimension_numbers<[1], [0], [0], [1], [0, 0, 1, 1], [], []>} : vector<64x32xf32>, vector<32x32xf32>, vector<64x32xf32> -> vector<64x32xf32>
    %cst_15 = arith.constant dense<0.000000e+00> : vector<64x32xf32>
    %24 = tpu.matmul %18, %20, %cst_15 {dimension_numbers = #tpu.dot_dimension_numbers<[1], [0], [0], [1], [0, 0, 1, 1], [], []>} : vector<64x32xf32>, vector<32x32xf32>, vector<64x32xf32> -> vector<64x32xf32>
    %cst_16 = arith.constant dense<0.000000e+00> : vector<64x32xf32>
    %25 = tpu.matmul %18, %21, %cst_16 {dimension_numbers = #tpu.dot_dimension_numbers<[1], [0], [0], [1], [0, 0, 1, 1], [], []>} : vector<64x32xf32>, vector<32x32xf32>, vector<64x32xf32> -> vector<64x32xf32>
    %cst_17 = arith.constant 0.000000e+00 : f32
    %26 = vector.broadcast %cst_17 : f32 to vector<8x32xf32>
    %27 = vector.extract_strided_slice %23 {offsets = [0, 0], sizes = [56, 32], strides = [1, 1]} : vector<64x32xf32> to vector<56x32xf32>
    %28 = tpu.concatenate %26, %27 in 0 : vector<8x32xf32>, vector<56x32xf32> -> vector<64x32xf32>
    %29 = vector.extract_strided_slice %25 {offsets = [8, 0], sizes = [56, 32], strides = [1, 1]} : vector<64x32xf32> to vector<56x32xf32>
    %30 = tpu.concatenate %29, %26 in 0 : vector<56x32xf32>, vector<8x32xf32> -> vector<64x32xf32>
    %31 = vector.broadcast %22 : vector<1x32xf32> to vector<64x32xf32>
    %32 = arith.addf %24, %31 : vector<64x32xf32>
    %33 = arith.addf %32, %28 : vector<64x32xf32>
    %34 = arith.addf %33, %30 : vector<64x32xf32>
    %cst_18 = arith.constant 0.000000e+00 : f32
    %35 = vector.broadcast %cst_18 : f32 to vector<64x32xf32>
    %36 = arith.maximumf %34, %35 : vector<64x32xf32>
    %37 = tpu.iota {dimensions = array<i32: 1>} : vector<8x128xi32>
    %c64_i32 = arith.constant 64 : i32
    %38 = vector.broadcast %c64_i32 : i32 to vector<8x128xi32>
    %39 = arith.cmpi sge, %37, %38 : vector<8x128xi32>
    %c96_i32 = arith.constant 96 : i32
    %40 = vector.broadcast %c96_i32 : i32 to vector<8x128xi32>
    %41 = arith.cmpi slt, %37, %40 : vector<8x128xi32>
    %42 = arith.andi %39, %41 : vector<8x128xi1>
    %cst_19 = arith.constant 2.000000e+00 : f32
    %cst_20 = arith.constant 1.000000e+00 : f32
    %43 = vector.broadcast %cst_19 : f32 to vector<8x128xf32>
    %44 = vector.broadcast %cst_20 : f32 to vector<8x128xf32>
    %45 = arith.select %42, %43, %44 : vector<8x128xi1>, vector<8x128xf32>
    %cst_21 = arith.constant 1.000000e+00 : f32
    %cst_22 = arith.constant 0.000000e+00 : f32
    %46 = vector.broadcast %cst_21 : f32 to vector<8x128xf32>
    %47 = vector.broadcast %cst_22 : f32 to vector<8x128xf32>
    %48 = arith.select %42, %46, %47 : vector<8x128xi1>, vector<8x128xf32>
    %c0_23 = arith.constant 0 : index
    %c0_24 = arith.constant 0 : index
    %49 = vector.load %arg2[%c0_23, %c0_24] : memref<144x128xf32, #tpu.memory_space<vmem>>, vector<32x128xf32>
    %c32_25 = arith.constant 32 : index
    %c0_26 = arith.constant 0 : index
    %50 = vector.load %arg2[%c32_25, %c0_26] : memref<144x128xf32, #tpu.memory_space<vmem>>, vector<32x128xf32>
    %c64_27 = arith.constant 64 : index
    %c0_28 = arith.constant 0 : index
    %51 = vector.load %arg2[%c64_27, %c0_28] : memref<144x128xf32, #tpu.memory_space<vmem>>, vector<1x128xf32>
    %c72 = arith.constant 72 : index
    %c0_29 = arith.constant 0 : index
    %52 = vector.load %arg2[%c72, %c0_29] : memref<144x128xf32, #tpu.memory_space<vmem>>, vector<32x128xf32>
    %c104 = arith.constant 104 : index
    %c0_30 = arith.constant 0 : index
    %53 = vector.load %arg2[%c104, %c0_30] : memref<144x128xf32, #tpu.memory_space<vmem>>, vector<32x128xf32>
    %c136 = arith.constant 136 : index
    %c0_31 = arith.constant 0 : index
    %54 = vector.load %arg2[%c136, %c0_31] : memref<144x128xf32, #tpu.memory_space<vmem>>, vector<1x128xf32>
    %55 = vector.shape_cast %54 : vector<1x128xf32> to vector<1x128xf32>
    %56 = vector.broadcast %55 : vector<1x128xf32> to vector<8x128xf32>
    %cst_32 = arith.constant dense<0.000000e+00> : vector<64x128xf32>
    %57 = tpu.matmul %36, %49, %cst_32 {dimension_numbers = #tpu.dot_dimension_numbers<[1], [0], [0], [1], [0, 0, 1, 1], [], []>} : vector<64x32xf32>, vector<32x128xf32>, vector<64x128xf32> -> vector<64x128xf32>
    %58 = vector.broadcast %51 : vector<1x128xf32> to vector<64x128xf32>
    %59 = arith.addf %57, %58 : vector<64x128xf32>
    %cst_33 = arith.constant 0.000000e+00 : f32
    %60 = vector.broadcast %cst_33 : f32 to vector<8x32xf32>
    %cst_34 = arith.constant 0.000000e+00 : f32
    %61 = vector.broadcast %cst_34 : f32 to vector<8x32xf32>
    %cst_35 = arith.constant 0.000000e+00 : f32
    %62 = vector.broadcast %cst_35 : f32 to vector<8x32xf32>
    %cst_36 = arith.constant 0.000000e+00 : f32
    %63 = vector.broadcast %cst_36 : f32 to vector<8x32xf32>
    %cst_37 = arith.constant 0.000000e+00 : f32
    %64 = vector.broadcast %cst_37 : f32 to vector<8x32xf32>
    %65 = vector.extract_strided_slice %59 {offsets = [0, 0], sizes = [8, 128], strides = [1, 1]} : vector<64x128xf32> to vector<8x128xf32>
    %cst_38 = arith.constant dense<0.000000e+00> : vector<8x128xf32>
    %66 = tpu.matmul %60, %50, %cst_38 {dimension_numbers = #tpu.dot_dimension_numbers<[1], [0], [0], [1], [0, 0, 1, 1], [], []>} : vector<8x32xf32>, vector<32x128xf32>, vector<8x128xf32> -> vector<8x128xf32>
    %67 = arith.addf %65, %66 : vector<8x128xf32>
    %68 = arith.mulf %67, %45 : vector<8x128xf32>
    %69 = arith.negf %68 : vector<8x128xf32>
    %70 = math.exp %69 : vector<8x128xf32>
    %cst_39 = arith.constant 1.000000e+00 : f32
    %71 = vector.broadcast %cst_39 : f32 to vector<8x128xf32>
    %72 = arith.addf %71, %70 : vector<8x128xf32>
    %73 = arith.divf %71, %72 : vector<8x128xf32>
    %74 = arith.mulf %73, %45 : vector<8x128xf32>
    %75 = arith.subf %74, %48 : vector<8x128xf32>
    %76 = vector.extract_strided_slice %75 {offsets = [0, 0], sizes = [8, 32], strides = [1, 1]} : vector<8x128xf32> to vector<8x32xf32>
    %77 = vector.extract_strided_slice %75 {offsets = [0, 32], sizes = [8, 32], strides = [1, 1]} : vector<8x128xf32> to vector<8x32xf32>
    %78 = vector.extract_strided_slice %75 {offsets = [0, 64], sizes = [8, 32], strides = [1, 1]} : vector<8x128xf32> to vector<8x32xf32>
    %79 = vector.extract_strided_slice %75 {offsets = [0, 96], sizes = [8, 32], strides = [1, 1]} : vector<8x128xf32> to vector<8x32xf32>
    %80 = arith.mulf %77, %62 : vector<8x32xf32>
    %81 = arith.mulf %76, %78 : vector<8x32xf32>
    %82 = arith.addf %80, %81 : vector<8x32xf32>
    %83 = math.tanh %82 : vector<8x32xf32>
    %84 = arith.mulf %79, %83 : vector<8x32xf32>
    %85 = vector.extract_strided_slice %59 {offsets = [8, 0], sizes = [8, 128], strides = [1, 1]} : vector<64x128xf32> to vector<8x128xf32>
    %cst_40 = arith.constant dense<0.000000e+00> : vector<8x128xf32>
    %86 = tpu.matmul %84, %50, %cst_40 {dimension_numbers = #tpu.dot_dimension_numbers<[1], [0], [0], [1], [0, 0, 1, 1], [], []>} : vector<8x32xf32>, vector<32x128xf32>, vector<8x128xf32> -> vector<8x128xf32>
    %87 = arith.addf %85, %86 : vector<8x128xf32>
    %88 = arith.mulf %87, %45 : vector<8x128xf32>
    %89 = arith.negf %88 : vector<8x128xf32>
    %90 = math.exp %89 : vector<8x128xf32>
    %cst_41 = arith.constant 1.000000e+00 : f32
    %91 = vector.broadcast %cst_41 : f32 to vector<8x128xf32>
    %92 = arith.addf %91, %90 : vector<8x128xf32>
    %93 = arith.divf %91, %92 : vector<8x128xf32>
    %94 = arith.mulf %93, %45 : vector<8x128xf32>
    %95 = arith.subf %94, %48 : vector<8x128xf32>
    %96 = vector.extract_strided_slice %95 {offsets = [0, 0], sizes = [8, 32], strides = [1, 1]} : vector<8x128xf32> to vector<8x32xf32>
    %97 = vector.extract_strided_slice %95 {offsets = [0, 32], sizes = [8, 32], strides = [1, 1]} : vector<8x128xf32> to vector<8x32xf32>
    %98 = vector.extract_strided_slice %95 {offsets = [0, 64], sizes = [8, 32], strides = [1, 1]} : vector<8x128xf32> to vector<8x32xf32>
    %99 = vector.extract_strided_slice %95 {offsets = [0, 96], sizes = [8, 32], strides = [1, 1]} : vector<8x128xf32> to vector<8x32xf32>
    %100 = arith.mulf %97, %82 : vector<8x32xf32>
    %101 = arith.mulf %96, %98 : vector<8x32xf32>
    %102 = arith.addf %100, %101 : vector<8x32xf32>
    %103 = math.tanh %102 : vector<8x32xf32>
    %104 = arith.mulf %99, %103 : vector<8x32xf32>
    %cst_42 = arith.constant dense<0.000000e+00> : vector<8x128xf32>
    %105 = tpu.matmul %84, %52, %cst_42 {dimension_numbers = #tpu.dot_dimension_numbers<[1], [0], [0], [1], [0, 0, 1, 1], [], []>} : vector<8x32xf32>, vector<32x128xf32>, vector<8x128xf32> -> vector<8x128xf32>
    %106 = arith.addf %105, %56 : vector<8x128xf32>
    %cst_43 = arith.constant dense<0.000000e+00> : vector<8x128xf32>
    %107 = tpu.matmul %61, %53, %cst_43 {dimension_numbers = #tpu.dot_dimension_numbers<[1], [0], [0], [1], [0, 0, 1, 1], [], []>} : vector<8x32xf32>, vector<32x128xf32>, vector<8x128xf32> -> vector<8x128xf32>
    %108 = arith.addf %106, %107 : vector<8x128xf32>
    %109 = arith.mulf %108, %45 : vector<8x128xf32>
    %110 = arith.negf %109 : vector<8x128xf32>
    %111 = math.exp %110 : vector<8x128xf32>
    %cst_44 = arith.constant 1.000000e+00 : f32
    %112 = vector.broadcast %cst_44 : f32 to vector<8x128xf32>
    %113 = arith.addf %112, %111 : vector<8x128xf32>
    %114 = arith.divf %112, %113 : vector<8x128xf32>
    %115 = arith.mulf %114, %45 : vector<8x128xf32>
    %116 = arith.subf %115, %48 : vector<8x128xf32>
    %117 = vector.extract_strided_slice %116 {offsets = [0, 0], sizes = [8, 32], strides = [1, 1]} : vector<8x128xf32> to vector<8x32xf32>
    %118 = vector.extract_strided_slice %116 {offsets = [0, 32], sizes = [8, 32], strides = [1, 1]} : vector<8x128xf32> to vector<8x32xf32>
    %119 = vector.extract_strided_slice %116 {offsets = [0, 64], sizes = [8, 32], strides = [1, 1]} : vector<8x128xf32> to vector<8x32xf32>
    %120 = vector.extract_strided_slice %116 {offsets = [0, 96], sizes = [8, 32], strides = [1, 1]} : vector<8x128xf32> to vector<8x32xf32>
    %121 = arith.mulf %118, %63 : vector<8x32xf32>
    %122 = arith.mulf %117, %119 : vector<8x32xf32>
    %123 = arith.addf %121, %122 : vector<8x32xf32>
    %124 = math.tanh %123 : vector<8x32xf32>
    %125 = arith.mulf %120, %124 : vector<8x32xf32>
    %c0_45 = arith.constant 0 : index
    %c0_46 = arith.constant 0 : index
    %126 = vector.load %arg3[%c0_45, %c0_46] : memref<344x32xf32, #tpu.memory_space<vmem>>, vector<32x32xf32>
    %cst_47 = arith.constant dense<0.000000e+00> : vector<8x32xf32>
    %127 = tpu.matmul %125, %126, %cst_47 {dimension_numbers = #tpu.dot_dimension_numbers<[1], [0], [0], [1], [0, 0, 1, 1], [], []>} : vector<8x32xf32>, vector<32x32xf32>, vector<8x32xf32> -> vector<8x32xf32>
    %128 = arith.addf %64, %127 : vector<8x32xf32>
    %129 = vector.extract_strided_slice %59 {offsets = [16, 0], sizes = [8, 128], strides = [1, 1]} : vector<64x128xf32> to vector<8x128xf32>
    %cst_48 = arith.constant dense<0.000000e+00> : vector<8x128xf32>
    %130 = tpu.matmul %104, %50, %cst_48 {dimension_numbers = #tpu.dot_dimension_numbers<[1], [0], [0], [1], [0, 0, 1, 1], [], []>} : vector<8x32xf32>, vector<32x128xf32>, vector<8x128xf32> -> vector<8x128xf32>
    %131 = arith.addf %129, %130 : vector<8x128xf32>
    %132 = arith.mulf %131, %45 : vector<8x128xf32>
    %133 = arith.negf %132 : vector<8x128xf32>
    %134 = math.exp %133 : vector<8x128xf32>
    %cst_49 = arith.constant 1.000000e+00 : f32
    %135 = vector.broadcast %cst_49 : f32 to vector<8x128xf32>
    %136 = arith.addf %135, %134 : vector<8x128xf32>
    %137 = arith.divf %135, %136 : vector<8x128xf32>
    %138 = arith.mulf %137, %45 : vector<8x128xf32>
    %139 = arith.subf %138, %48 : vector<8x128xf32>
    %140 = vector.extract_strided_slice %139 {offsets = [0, 0], sizes = [8, 32], strides = [1, 1]} : vector<8x128xf32> to vector<8x32xf32>
    %141 = vector.extract_strided_slice %139 {offsets = [0, 32], sizes = [8, 32], strides = [1, 1]} : vector<8x128xf32> to vector<8x32xf32>
    %142 = vector.extract_strided_slice %139 {offsets = [0, 64], sizes = [8, 32], strides = [1, 1]} : vector<8x128xf32> to vector<8x32xf32>
    %143 = vector.extract_strided_slice %139 {offsets = [0, 96], sizes = [8, 32], strides = [1, 1]} : vector<8x128xf32> to vector<8x32xf32>
    %144 = arith.mulf %141, %102 : vector<8x32xf32>
    %145 = arith.mulf %140, %142 : vector<8x32xf32>
    %146 = arith.addf %144, %145 : vector<8x32xf32>
    %147 = math.tanh %146 : vector<8x32xf32>
    %148 = arith.mulf %143, %147 : vector<8x32xf32>
    %cst_50 = arith.constant dense<0.000000e+00> : vector<8x128xf32>
    %149 = tpu.matmul %104, %52, %cst_50 {dimension_numbers = #tpu.dot_dimension_numbers<[1], [0], [0], [1], [0, 0, 1, 1], [], []>} : vector<8x32xf32>, vector<32x128xf32>, vector<8x128xf32> -> vector<8x128xf32>
    %150 = arith.addf %149, %56 : vector<8x128xf32>
    %cst_51 = arith.constant dense<0.000000e+00> : vector<8x128xf32>
    %151 = tpu.matmul %125, %53, %cst_51 {dimension_numbers = #tpu.dot_dimension_numbers<[1], [0], [0], [1], [0, 0, 1, 1], [], []>} : vector<8x32xf32>, vector<32x128xf32>, vector<8x128xf32> -> vector<8x128xf32>
    %152 = arith.addf %150, %151 : vector<8x128xf32>
    %153 = arith.mulf %152, %45 : vector<8x128xf32>
    %154 = arith.negf %153 : vector<8x128xf32>
    %155 = math.exp %154 : vector<8x128xf32>
    %cst_52 = arith.constant 1.000000e+00 : f32
    %156 = vector.broadcast %cst_52 : f32 to vector<8x128xf32>
    %157 = arith.addf %156, %155 : vector<8x128xf32>
    %158 = arith.divf %156, %157 : vector<8x128xf32>
    %159 = arith.mulf %158, %45 : vector<8x128xf32>
    %160 = arith.subf %159, %48 : vector<8x128xf32>
    %161 = vector.extract_strided_slice %160 {offsets = [0, 0], sizes = [8, 32], strides = [1, 1]} : vector<8x128xf32> to vector<8x32xf32>
    %162 = vector.extract_strided_slice %160 {offsets = [0, 32], sizes = [8, 32], strides = [1, 1]} : vector<8x128xf32> to vector<8x32xf32>
    %163 = vector.extract_strided_slice %160 {offsets = [0, 64], sizes = [8, 32], strides = [1, 1]} : vector<8x128xf32> to vector<8x32xf32>
    %164 = vector.extract_strided_slice %160 {offsets = [0, 96], sizes = [8, 32], strides = [1, 1]} : vector<8x128xf32> to vector<8x32xf32>
    %165 = arith.mulf %162, %123 : vector<8x32xf32>
    %166 = arith.mulf %161, %163 : vector<8x32xf32>
    %167 = arith.addf %165, %166 : vector<8x32xf32>
    %168 = math.tanh %167 : vector<8x32xf32>
    %169 = arith.mulf %164, %168 : vector<8x32xf32>
    %c32_53 = arith.constant 32 : index
    %c0_54 = arith.constant 0 : index
    %170 = vector.load %arg3[%c32_53, %c0_54] : memref<344x32xf32, #tpu.memory_space<vmem>>, vector<32x32xf32>
    %cst_55 = arith.constant dense<0.000000e+00> : vector<8x32xf32>
    %171 = tpu.matmul %169, %170, %cst_55 {dimension_numbers = #tpu.dot_dimension_numbers<[1], [0], [0], [1], [0, 0, 1, 1], [], []>} : vector<8x32xf32>, vector<32x32xf32>, vector<8x32xf32> -> vector<8x32xf32>
    %172 = arith.addf %128, %171 : vector<8x32xf32>
    %173 = vector.extract_strided_slice %59 {offsets = [24, 0], sizes = [8, 128], strides = [1, 1]} : vector<64x128xf32> to vector<8x128xf32>
    %cst_56 = arith.constant dense<0.000000e+00> : vector<8x128xf32>
    %174 = tpu.matmul %148, %50, %cst_56 {dimension_numbers = #tpu.dot_dimension_numbers<[1], [0], [0], [1], [0, 0, 1, 1], [], []>} : vector<8x32xf32>, vector<32x128xf32>, vector<8x128xf32> -> vector<8x128xf32>
    %175 = arith.addf %173, %174 : vector<8x128xf32>
    %176 = arith.mulf %175, %45 : vector<8x128xf32>
    %177 = arith.negf %176 : vector<8x128xf32>
    %178 = math.exp %177 : vector<8x128xf32>
    %cst_57 = arith.constant 1.000000e+00 : f32
    %179 = vector.broadcast %cst_57 : f32 to vector<8x128xf32>
    %180 = arith.addf %179, %178 : vector<8x128xf32>
    %181 = arith.divf %179, %180 : vector<8x128xf32>
    %182 = arith.mulf %181, %45 : vector<8x128xf32>
    %183 = arith.subf %182, %48 : vector<8x128xf32>
    %184 = vector.extract_strided_slice %183 {offsets = [0, 0], sizes = [8, 32], strides = [1, 1]} : vector<8x128xf32> to vector<8x32xf32>
    %185 = vector.extract_strided_slice %183 {offsets = [0, 32], sizes = [8, 32], strides = [1, 1]} : vector<8x128xf32> to vector<8x32xf32>
    %186 = vector.extract_strided_slice %183 {offsets = [0, 64], sizes = [8, 32], strides = [1, 1]} : vector<8x128xf32> to vector<8x32xf32>
    %187 = vector.extract_strided_slice %183 {offsets = [0, 96], sizes = [8, 32], strides = [1, 1]} : vector<8x128xf32> to vector<8x32xf32>
    %188 = arith.mulf %185, %146 : vector<8x32xf32>
    %189 = arith.mulf %184, %186 : vector<8x32xf32>
    %190 = arith.addf %188, %189 : vector<8x32xf32>
    %191 = math.tanh %190 : vector<8x32xf32>
    %192 = arith.mulf %187, %191 : vector<8x32xf32>
    %cst_58 = arith.constant dense<0.000000e+00> : vector<8x128xf32>
    %193 = tpu.matmul %148, %52, %cst_58 {dimension_numbers = #tpu.dot_dimension_numbers<[1], [0], [0], [1], [0, 0, 1, 1], [], []>} : vector<8x32xf32>, vector<32x128xf32>, vector<8x128xf32> -> vector<8x128xf32>
    %194 = arith.addf %193, %56 : vector<8x128xf32>
    %cst_59 = arith.constant dense<0.000000e+00> : vector<8x128xf32>
    %195 = tpu.matmul %169, %53, %cst_59 {dimension_numbers = #tpu.dot_dimension_numbers<[1], [0], [0], [1], [0, 0, 1, 1], [], []>} : vector<8x32xf32>, vector<32x128xf32>, vector<8x128xf32> -> vector<8x128xf32>
    %196 = arith.addf %194, %195 : vector<8x128xf32>
    %197 = arith.mulf %196, %45 : vector<8x128xf32>
    %198 = arith.negf %197 : vector<8x128xf32>
    %199 = math.exp %198 : vector<8x128xf32>
    %cst_60 = arith.constant 1.000000e+00 : f32
    %200 = vector.broadcast %cst_60 : f32 to vector<8x128xf32>
    %201 = arith.addf %200, %199 : vector<8x128xf32>
    %202 = arith.divf %200, %201 : vector<8x128xf32>
    %203 = arith.mulf %202, %45 : vector<8x128xf32>
    %204 = arith.subf %203, %48 : vector<8x128xf32>
    %205 = vector.extract_strided_slice %204 {offsets = [0, 0], sizes = [8, 32], strides = [1, 1]} : vector<8x128xf32> to vector<8x32xf32>
    %206 = vector.extract_strided_slice %204 {offsets = [0, 32], sizes = [8, 32], strides = [1, 1]} : vector<8x128xf32> to vector<8x32xf32>
    %207 = vector.extract_strided_slice %204 {offsets = [0, 64], sizes = [8, 32], strides = [1, 1]} : vector<8x128xf32> to vector<8x32xf32>
    %208 = vector.extract_strided_slice %204 {offsets = [0, 96], sizes = [8, 32], strides = [1, 1]} : vector<8x128xf32> to vector<8x32xf32>
    %209 = arith.mulf %206, %167 : vector<8x32xf32>
    %210 = arith.mulf %205, %207 : vector<8x32xf32>
    %211 = arith.addf %209, %210 : vector<8x32xf32>
    %212 = math.tanh %211 : vector<8x32xf32>
    %213 = arith.mulf %208, %212 : vector<8x32xf32>
    %c64_61 = arith.constant 64 : index
    %c0_62 = arith.constant 0 : index
    %214 = vector.load %arg3[%c64_61, %c0_62] : memref<344x32xf32, #tpu.memory_space<vmem>>, vector<32x32xf32>
    %cst_63 = arith.constant dense<0.000000e+00> : vector<8x32xf32>
    %215 = tpu.matmul %213, %214, %cst_63 {dimension_numbers = #tpu.dot_dimension_numbers<[1], [0], [0], [1], [0, 0, 1, 1], [], []>} : vector<8x32xf32>, vector<32x32xf32>, vector<8x32xf32> -> vector<8x32xf32>
    %216 = arith.addf %172, %215 : vector<8x32xf32>
    %217 = vector.extract_strided_slice %59 {offsets = [32, 0], sizes = [8, 128], strides = [1, 1]} : vector<64x128xf32> to vector<8x128xf32>
    %cst_64 = arith.constant dense<0.000000e+00> : vector<8x128xf32>
    %218 = tpu.matmul %192, %50, %cst_64 {dimension_numbers = #tpu.dot_dimension_numbers<[1], [0], [0], [1], [0, 0, 1, 1], [], []>} : vector<8x32xf32>, vector<32x128xf32>, vector<8x128xf32> -> vector<8x128xf32>
    %219 = arith.addf %217, %218 : vector<8x128xf32>
    %220 = arith.mulf %219, %45 : vector<8x128xf32>
    %221 = arith.negf %220 : vector<8x128xf32>
    %222 = math.exp %221 : vector<8x128xf32>
    %cst_65 = arith.constant 1.000000e+00 : f32
    %223 = vector.broadcast %cst_65 : f32 to vector<8x128xf32>
    %224 = arith.addf %223, %222 : vector<8x128xf32>
    %225 = arith.divf %223, %224 : vector<8x128xf32>
    %226 = arith.mulf %225, %45 : vector<8x128xf32>
    %227 = arith.subf %226, %48 : vector<8x128xf32>
    %228 = vector.extract_strided_slice %227 {offsets = [0, 0], sizes = [8, 32], strides = [1, 1]} : vector<8x128xf32> to vector<8x32xf32>
    %229 = vector.extract_strided_slice %227 {offsets = [0, 32], sizes = [8, 32], strides = [1, 1]} : vector<8x128xf32> to vector<8x32xf32>
    %230 = vector.extract_strided_slice %227 {offsets = [0, 64], sizes = [8, 32], strides = [1, 1]} : vector<8x128xf32> to vector<8x32xf32>
    %231 = vector.extract_strided_slice %227 {offsets = [0, 96], sizes = [8, 32], strides = [1, 1]} : vector<8x128xf32> to vector<8x32xf32>
    %232 = arith.mulf %229, %190 : vector<8x32xf32>
    %233 = arith.mulf %228, %230 : vector<8x32xf32>
    %234 = arith.addf %232, %233 : vector<8x32xf32>
    %235 = math.tanh %234 : vector<8x32xf32>
    %236 = arith.mulf %231, %235 : vector<8x32xf32>
    %cst_66 = arith.constant dense<0.000000e+00> : vector<8x128xf32>
    %237 = tpu.matmul %192, %52, %cst_66 {dimension_numbers = #tpu.dot_dimension_numbers<[1], [0], [0], [1], [0, 0, 1, 1], [], []>} : vector<8x32xf32>, vector<32x128xf32>, vector<8x128xf32> -> vector<8x128xf32>
    %238 = arith.addf %237, %56 : vector<8x128xf32>
    %cst_67 = arith.constant dense<0.000000e+00> : vector<8x128xf32>
    %239 = tpu.matmul %213, %53, %cst_67 {dimension_numbers = #tpu.dot_dimension_numbers<[1], [0], [0], [1], [0, 0, 1, 1], [], []>} : vector<8x32xf32>, vector<32x128xf32>, vector<8x128xf32> -> vector<8x128xf32>
    %240 = arith.addf %238, %239 : vector<8x128xf32>
    %241 = arith.mulf %240, %45 : vector<8x128xf32>
    %242 = arith.negf %241 : vector<8x128xf32>
    %243 = math.exp %242 : vector<8x128xf32>
    %cst_68 = arith.constant 1.000000e+00 : f32
    %244 = vector.broadcast %cst_68 : f32 to vector<8x128xf32>
    %245 = arith.addf %244, %243 : vector<8x128xf32>
    %246 = arith.divf %244, %245 : vector<8x128xf32>
    %247 = arith.mulf %246, %45 : vector<8x128xf32>
    %248 = arith.subf %247, %48 : vector<8x128xf32>
    %249 = vector.extract_strided_slice %248 {offsets = [0, 0], sizes = [8, 32], strides = [1, 1]} : vector<8x128xf32> to vector<8x32xf32>
    %250 = vector.extract_strided_slice %248 {offsets = [0, 32], sizes = [8, 32], strides = [1, 1]} : vector<8x128xf32> to vector<8x32xf32>
    %251 = vector.extract_strided_slice %248 {offsets = [0, 64], sizes = [8, 32], strides = [1, 1]} : vector<8x128xf32> to vector<8x32xf32>
    %252 = vector.extract_strided_slice %248 {offsets = [0, 96], sizes = [8, 32], strides = [1, 1]} : vector<8x128xf32> to vector<8x32xf32>
    %253 = arith.mulf %250, %211 : vector<8x32xf32>
    %254 = arith.mulf %249, %251 : vector<8x32xf32>
    %255 = arith.addf %253, %254 : vector<8x32xf32>
    %256 = math.tanh %255 : vector<8x32xf32>
    %257 = arith.mulf %252, %256 : vector<8x32xf32>
    %c96_69 = arith.constant 96 : index
    %c0_70 = arith.constant 0 : index
    %258 = vector.load %arg3[%c96_69, %c0_70] : memref<344x32xf32, #tpu.memory_space<vmem>>, vector<32x32xf32>
    %cst_71 = arith.constant dense<0.000000e+00> : vector<8x32xf32>
    %259 = tpu.matmul %257, %258, %cst_71 {dimension_numbers = #tpu.dot_dimension_numbers<[1], [0], [0], [1], [0, 0, 1, 1], [], []>} : vector<8x32xf32>, vector<32x32xf32>, vector<8x32xf32> -> vector<8x32xf32>
    %260 = arith.addf %216, %259 : vector<8x32xf32>
    %261 = vector.extract_strided_slice %59 {offsets = [40, 0], sizes = [8, 128], strides = [1, 1]} : vector<64x128xf32> to vector<8x128xf32>
    %cst_72 = arith.constant dense<0.000000e+00> : vector<8x128xf32>
    %262 = tpu.matmul %236, %50, %cst_72 {dimension_numbers = #tpu.dot_dimension_numbers<[1], [0], [0], [1], [0, 0, 1, 1], [], []>} : vector<8x32xf32>, vector<32x128xf32>, vector<8x128xf32> -> vector<8x128xf32>
    %263 = arith.addf %261, %262 : vector<8x128xf32>
    %264 = arith.mulf %263, %45 : vector<8x128xf32>
    %265 = arith.negf %264 : vector<8x128xf32>
    %266 = math.exp %265 : vector<8x128xf32>
    %cst_73 = arith.constant 1.000000e+00 : f32
    %267 = vector.broadcast %cst_73 : f32 to vector<8x128xf32>
    %268 = arith.addf %267, %266 : vector<8x128xf32>
    %269 = arith.divf %267, %268 : vector<8x128xf32>
    %270 = arith.mulf %269, %45 : vector<8x128xf32>
    %271 = arith.subf %270, %48 : vector<8x128xf32>
    %272 = vector.extract_strided_slice %271 {offsets = [0, 0], sizes = [8, 32], strides = [1, 1]} : vector<8x128xf32> to vector<8x32xf32>
    %273 = vector.extract_strided_slice %271 {offsets = [0, 32], sizes = [8, 32], strides = [1, 1]} : vector<8x128xf32> to vector<8x32xf32>
    %274 = vector.extract_strided_slice %271 {offsets = [0, 64], sizes = [8, 32], strides = [1, 1]} : vector<8x128xf32> to vector<8x32xf32>
    %275 = vector.extract_strided_slice %271 {offsets = [0, 96], sizes = [8, 32], strides = [1, 1]} : vector<8x128xf32> to vector<8x32xf32>
    %276 = arith.mulf %273, %234 : vector<8x32xf32>
    %277 = arith.mulf %272, %274 : vector<8x32xf32>
    %278 = arith.addf %276, %277 : vector<8x32xf32>
    %279 = math.tanh %278 : vector<8x32xf32>
    %280 = arith.mulf %275, %279 : vector<8x32xf32>
    %cst_74 = arith.constant dense<0.000000e+00> : vector<8x128xf32>
    %281 = tpu.matmul %236, %52, %cst_74 {dimension_numbers = #tpu.dot_dimension_numbers<[1], [0], [0], [1], [0, 0, 1, 1], [], []>} : vector<8x32xf32>, vector<32x128xf32>, vector<8x128xf32> -> vector<8x128xf32>
    %282 = arith.addf %281, %56 : vector<8x128xf32>
    %cst_75 = arith.constant dense<0.000000e+00> : vector<8x128xf32>
    %283 = tpu.matmul %257, %53, %cst_75 {dimension_numbers = #tpu.dot_dimension_numbers<[1], [0], [0], [1], [0, 0, 1, 1], [], []>} : vector<8x32xf32>, vector<32x128xf32>, vector<8x128xf32> -> vector<8x128xf32>
    %284 = arith.addf %282, %283 : vector<8x128xf32>
    %285 = arith.mulf %284, %45 : vector<8x128xf32>
    %286 = arith.negf %285 : vector<8x128xf32>
    %287 = math.exp %286 : vector<8x128xf32>
    %cst_76 = arith.constant 1.000000e+00 : f32
    %288 = vector.broadcast %cst_76 : f32 to vector<8x128xf32>
    %289 = arith.addf %288, %287 : vector<8x128xf32>
    %290 = arith.divf %288, %289 : vector<8x128xf32>
    %291 = arith.mulf %290, %45 : vector<8x128xf32>
    %292 = arith.subf %291, %48 : vector<8x128xf32>
    %293 = vector.extract_strided_slice %292 {offsets = [0, 0], sizes = [8, 32], strides = [1, 1]} : vector<8x128xf32> to vector<8x32xf32>
    %294 = vector.extract_strided_slice %292 {offsets = [0, 32], sizes = [8, 32], strides = [1, 1]} : vector<8x128xf32> to vector<8x32xf32>
    %295 = vector.extract_strided_slice %292 {offsets = [0, 64], sizes = [8, 32], strides = [1, 1]} : vector<8x128xf32> to vector<8x32xf32>
    %296 = vector.extract_strided_slice %292 {offsets = [0, 96], sizes = [8, 32], strides = [1, 1]} : vector<8x128xf32> to vector<8x32xf32>
    %297 = arith.mulf %294, %255 : vector<8x32xf32>
    %298 = arith.mulf %293, %295 : vector<8x32xf32>
    %299 = arith.addf %297, %298 : vector<8x32xf32>
    %300 = math.tanh %299 : vector<8x32xf32>
    %301 = arith.mulf %296, %300 : vector<8x32xf32>
    %c128_77 = arith.constant 128 : index
    %c0_78 = arith.constant 0 : index
    %302 = vector.load %arg3[%c128_77, %c0_78] : memref<344x32xf32, #tpu.memory_space<vmem>>, vector<32x32xf32>
    %cst_79 = arith.constant dense<0.000000e+00> : vector<8x32xf32>
    %303 = tpu.matmul %301, %302, %cst_79 {dimension_numbers = #tpu.dot_dimension_numbers<[1], [0], [0], [1], [0, 0, 1, 1], [], []>} : vector<8x32xf32>, vector<32x32xf32>, vector<8x32xf32> -> vector<8x32xf32>
    %304 = arith.addf %260, %303 : vector<8x32xf32>
    %305 = vector.extract_strided_slice %59 {offsets = [48, 0], sizes = [8, 128], strides = [1, 1]} : vector<64x128xf32> to vector<8x128xf32>
    %cst_80 = arith.constant dense<0.000000e+00> : vector<8x128xf32>
    %306 = tpu.matmul %280, %50, %cst_80 {dimension_numbers = #tpu.dot_dimension_numbers<[1], [0], [0], [1], [0, 0, 1, 1], [], []>} : vector<8x32xf32>, vector<32x128xf32>, vector<8x128xf32> -> vector<8x128xf32>
    %307 = arith.addf %305, %306 : vector<8x128xf32>
    %308 = arith.mulf %307, %45 : vector<8x128xf32>
    %309 = arith.negf %308 : vector<8x128xf32>
    %310 = math.exp %309 : vector<8x128xf32>
    %cst_81 = arith.constant 1.000000e+00 : f32
    %311 = vector.broadcast %cst_81 : f32 to vector<8x128xf32>
    %312 = arith.addf %311, %310 : vector<8x128xf32>
    %313 = arith.divf %311, %312 : vector<8x128xf32>
    %314 = arith.mulf %313, %45 : vector<8x128xf32>
    %315 = arith.subf %314, %48 : vector<8x128xf32>
    %316 = vector.extract_strided_slice %315 {offsets = [0, 0], sizes = [8, 32], strides = [1, 1]} : vector<8x128xf32> to vector<8x32xf32>
    %317 = vector.extract_strided_slice %315 {offsets = [0, 32], sizes = [8, 32], strides = [1, 1]} : vector<8x128xf32> to vector<8x32xf32>
    %318 = vector.extract_strided_slice %315 {offsets = [0, 64], sizes = [8, 32], strides = [1, 1]} : vector<8x128xf32> to vector<8x32xf32>
    %319 = vector.extract_strided_slice %315 {offsets = [0, 96], sizes = [8, 32], strides = [1, 1]} : vector<8x128xf32> to vector<8x32xf32>
    %320 = arith.mulf %317, %278 : vector<8x32xf32>
    %321 = arith.mulf %316, %318 : vector<8x32xf32>
    %322 = arith.addf %320, %321 : vector<8x32xf32>
    %323 = math.tanh %322 : vector<8x32xf32>
    %324 = arith.mulf %319, %323 : vector<8x32xf32>
    %cst_82 = arith.constant dense<0.000000e+00> : vector<8x128xf32>
    %325 = tpu.matmul %280, %52, %cst_82 {dimension_numbers = #tpu.dot_dimension_numbers<[1], [0], [0], [1], [0, 0, 1, 1], [], []>} : vector<8x32xf32>, vector<32x128xf32>, vector<8x128xf32> -> vector<8x128xf32>
    %326 = arith.addf %325, %56 : vector<8x128xf32>
    %cst_83 = arith.constant dense<0.000000e+00> : vector<8x128xf32>
    %327 = tpu.matmul %301, %53, %cst_83 {dimension_numbers = #tpu.dot_dimension_numbers<[1], [0], [0], [1], [0, 0, 1, 1], [], []>} : vector<8x32xf32>, vector<32x128xf32>, vector<8x128xf32> -> vector<8x128xf32>
    %328 = arith.addf %326, %327 : vector<8x128xf32>
    %329 = arith.mulf %328, %45 : vector<8x128xf32>
    %330 = arith.negf %329 : vector<8x128xf32>
    %331 = math.exp %330 : vector<8x128xf32>
    %cst_84 = arith.constant 1.000000e+00 : f32
    %332 = vector.broadcast %cst_84 : f32 to vector<8x128xf32>
    %333 = arith.addf %332, %331 : vector<8x128xf32>
    %334 = arith.divf %332, %333 : vector<8x128xf32>
    %335 = arith.mulf %334, %45 : vector<8x128xf32>
    %336 = arith.subf %335, %48 : vector<8x128xf32>
    %337 = vector.extract_strided_slice %336 {offsets = [0, 0], sizes = [8, 32], strides = [1, 1]} : vector<8x128xf32> to vector<8x32xf32>
    %338 = vector.extract_strided_slice %336 {offsets = [0, 32], sizes = [8, 32], strides = [1, 1]} : vector<8x128xf32> to vector<8x32xf32>
    %339 = vector.extract_strided_slice %336 {offsets = [0, 64], sizes = [8, 32], strides = [1, 1]} : vector<8x128xf32> to vector<8x32xf32>
    %340 = vector.extract_strided_slice %336 {offsets = [0, 96], sizes = [8, 32], strides = [1, 1]} : vector<8x128xf32> to vector<8x32xf32>
    %341 = arith.mulf %338, %299 : vector<8x32xf32>
    %342 = arith.mulf %337, %339 : vector<8x32xf32>
    %343 = arith.addf %341, %342 : vector<8x32xf32>
    %344 = math.tanh %343 : vector<8x32xf32>
    %345 = arith.mulf %340, %344 : vector<8x32xf32>
    %c160 = arith.constant 160 : index
    %c0_85 = arith.constant 0 : index
    %346 = vector.load %arg3[%c160, %c0_85] : memref<344x32xf32, #tpu.memory_space<vmem>>, vector<32x32xf32>
    %cst_86 = arith.constant dense<0.000000e+00> : vector<8x32xf32>
    %347 = tpu.matmul %345, %346, %cst_86 {dimension_numbers = #tpu.dot_dimension_numbers<[1], [0], [0], [1], [0, 0, 1, 1], [], []>} : vector<8x32xf32>, vector<32x32xf32>, vector<8x32xf32> -> vector<8x32xf32>
    %348 = arith.addf %304, %347 : vector<8x32xf32>
    %349 = vector.extract_strided_slice %59 {offsets = [56, 0], sizes = [8, 128], strides = [1, 1]} : vector<64x128xf32> to vector<8x128xf32>
    %cst_87 = arith.constant dense<0.000000e+00> : vector<8x128xf32>
    %350 = tpu.matmul %324, %50, %cst_87 {dimension_numbers = #tpu.dot_dimension_numbers<[1], [0], [0], [1], [0, 0, 1, 1], [], []>} : vector<8x32xf32>, vector<32x128xf32>, vector<8x128xf32> -> vector<8x128xf32>
    %351 = arith.addf %349, %350 : vector<8x128xf32>
    %352 = arith.mulf %351, %45 : vector<8x128xf32>
    %353 = arith.negf %352 : vector<8x128xf32>
    %354 = math.exp %353 : vector<8x128xf32>
    %cst_88 = arith.constant 1.000000e+00 : f32
    %355 = vector.broadcast %cst_88 : f32 to vector<8x128xf32>
    %356 = arith.addf %355, %354 : vector<8x128xf32>
    %357 = arith.divf %355, %356 : vector<8x128xf32>
    %358 = arith.mulf %357, %45 : vector<8x128xf32>
    %359 = arith.subf %358, %48 : vector<8x128xf32>
    %360 = vector.extract_strided_slice %359 {offsets = [0, 0], sizes = [8, 32], strides = [1, 1]} : vector<8x128xf32> to vector<8x32xf32>
    %361 = vector.extract_strided_slice %359 {offsets = [0, 32], sizes = [8, 32], strides = [1, 1]} : vector<8x128xf32> to vector<8x32xf32>
    %362 = vector.extract_strided_slice %359 {offsets = [0, 64], sizes = [8, 32], strides = [1, 1]} : vector<8x128xf32> to vector<8x32xf32>
    %363 = vector.extract_strided_slice %359 {offsets = [0, 96], sizes = [8, 32], strides = [1, 1]} : vector<8x128xf32> to vector<8x32xf32>
    %364 = arith.mulf %361, %322 : vector<8x32xf32>
    %365 = arith.mulf %360, %362 : vector<8x32xf32>
    %366 = arith.addf %364, %365 : vector<8x32xf32>
    %367 = math.tanh %366 : vector<8x32xf32>
    %368 = arith.mulf %363, %367 : vector<8x32xf32>
    %cst_89 = arith.constant dense<0.000000e+00> : vector<8x128xf32>
    %369 = tpu.matmul %324, %52, %cst_89 {dimension_numbers = #tpu.dot_dimension_numbers<[1], [0], [0], [1], [0, 0, 1, 1], [], []>} : vector<8x32xf32>, vector<32x128xf32>, vector<8x128xf32> -> vector<8x128xf32>
    %370 = arith.addf %369, %56 : vector<8x128xf32>
    %cst_90 = arith.constant dense<0.000000e+00> : vector<8x128xf32>
    %371 = tpu.matmul %345, %53, %cst_90 {dimension_numbers = #tpu.dot_dimension_numbers<[1], [0], [0], [1], [0, 0, 1, 1], [], []>} : vector<8x32xf32>, vector<32x128xf32>, vector<8x128xf32> -> vector<8x128xf32>
    %372 = arith.addf %370, %371 : vector<8x128xf32>
    %373 = arith.mulf %372, %45 : vector<8x128xf32>
    %374 = arith.negf %373 : vector<8x128xf32>
    %375 = math.exp %374 : vector<8x128xf32>
    %cst_91 = arith.constant 1.000000e+00 : f32
    %376 = vector.broadcast %cst_91 : f32 to vector<8x128xf32>
    %377 = arith.addf %376, %375 : vector<8x128xf32>
    %378 = arith.divf %376, %377 : vector<8x128xf32>
    %379 = arith.mulf %378, %45 : vector<8x128xf32>
    %380 = arith.subf %379, %48 : vector<8x128xf32>
    %381 = vector.extract_strided_slice %380 {offsets = [0, 0], sizes = [8, 32], strides = [1, 1]} : vector<8x128xf32> to vector<8x32xf32>
    %382 = vector.extract_strided_slice %380 {offsets = [0, 32], sizes = [8, 32], strides = [1, 1]} : vector<8x128xf32> to vector<8x32xf32>
    %383 = vector.extract_strided_slice %380 {offsets = [0, 64], sizes = [8, 32], strides = [1, 1]} : vector<8x128xf32> to vector<8x32xf32>
    %384 = vector.extract_strided_slice %380 {offsets = [0, 96], sizes = [8, 32], strides = [1, 1]} : vector<8x128xf32> to vector<8x32xf32>
    %385 = arith.mulf %382, %343 : vector<8x32xf32>
    %386 = arith.mulf %381, %383 : vector<8x32xf32>
    %387 = arith.addf %385, %386 : vector<8x32xf32>
    %388 = math.tanh %387 : vector<8x32xf32>
    %389 = arith.mulf %384, %388 : vector<8x32xf32>
    %c192 = arith.constant 192 : index
    %c0_92 = arith.constant 0 : index
    %390 = vector.load %arg3[%c192, %c0_92] : memref<344x32xf32, #tpu.memory_space<vmem>>, vector<32x32xf32>
    %cst_93 = arith.constant dense<0.000000e+00> : vector<8x32xf32>
    %391 = tpu.matmul %389, %390, %cst_93 {dimension_numbers = #tpu.dot_dimension_numbers<[1], [0], [0], [1], [0, 0, 1, 1], [], []>} : vector<8x32xf32>, vector<32x32xf32>, vector<8x32xf32> -> vector<8x32xf32>
    %392 = arith.addf %348, %391 : vector<8x32xf32>
    %cst_94 = arith.constant dense<0.000000e+00> : vector<8x128xf32>
    %393 = tpu.matmul %368, %52, %cst_94 {dimension_numbers = #tpu.dot_dimension_numbers<[1], [0], [0], [1], [0, 0, 1, 1], [], []>} : vector<8x32xf32>, vector<32x128xf32>, vector<8x128xf32> -> vector<8x128xf32>
    %394 = arith.addf %393, %56 : vector<8x128xf32>
    %cst_95 = arith.constant dense<0.000000e+00> : vector<8x128xf32>
    %395 = tpu.matmul %389, %53, %cst_95 {dimension_numbers = #tpu.dot_dimension_numbers<[1], [0], [0], [1], [0, 0, 1, 1], [], []>} : vector<8x32xf32>, vector<32x128xf32>, vector<8x128xf32> -> vector<8x128xf32>
    %396 = arith.addf %394, %395 : vector<8x128xf32>
    %397 = arith.mulf %396, %45 : vector<8x128xf32>
    %398 = arith.negf %397 : vector<8x128xf32>
    %399 = math.exp %398 : vector<8x128xf32>
    %cst_96 = arith.constant 1.000000e+00 : f32
    %400 = vector.broadcast %cst_96 : f32 to vector<8x128xf32>
    %401 = arith.addf %400, %399 : vector<8x128xf32>
    %402 = arith.divf %400, %401 : vector<8x128xf32>
    %403 = arith.mulf %402, %45 : vector<8x128xf32>
    %404 = arith.subf %403, %48 : vector<8x128xf32>
    %405 = vector.extract_strided_slice %404 {offsets = [0, 0], sizes = [8, 32], strides = [1, 1]} : vector<8x128xf32> to vector<8x32xf32>
    %406 = vector.extract_strided_slice %404 {offsets = [0, 32], sizes = [8, 32], strides = [1, 1]} : vector<8x128xf32> to vector<8x32xf32>
    %407 = vector.extract_strided_slice %404 {offsets = [0, 64], sizes = [8, 32], strides = [1, 1]} : vector<8x128xf32> to vector<8x32xf32>
    %408 = vector.extract_strided_slice %404 {offsets = [0, 96], sizes = [8, 32], strides = [1, 1]} : vector<8x128xf32> to vector<8x32xf32>
    %409 = arith.mulf %406, %387 : vector<8x32xf32>
    %410 = arith.mulf %405, %407 : vector<8x32xf32>
    %411 = arith.addf %409, %410 : vector<8x32xf32>
    %412 = math.tanh %411 : vector<8x32xf32>
    %413 = arith.mulf %408, %412 : vector<8x32xf32>
    %c224 = arith.constant 224 : index
    %c0_97 = arith.constant 0 : index
    %414 = vector.load %arg3[%c224, %c0_97] : memref<344x32xf32, #tpu.memory_space<vmem>>, vector<32x32xf32>
    %cst_98 = arith.constant dense<0.000000e+00> : vector<8x32xf32>
    %415 = tpu.matmul %413, %414, %cst_98 {dimension_numbers = #tpu.dot_dimension_numbers<[1], [0], [0], [1], [0, 0, 1, 1], [], []>} : vector<8x32xf32>, vector<32x32xf32>, vector<8x32xf32> -> vector<8x32xf32>
    %416 = arith.addf %392, %415 : vector<8x32xf32>
    %c256 = arith.constant 256 : index
    %c0_99 = arith.constant 0 : index
    %417 = vector.load %arg3[%c256, %c0_99] : memref<344x32xf32, #tpu.memory_space<vmem>>, vector<1x32xf32>
    %418 = vector.broadcast %417 : vector<1x32xf32> to vector<8x32xf32>
    %419 = arith.addf %416, %418 : vector<8x32xf32>
    %cst_100 = arith.constant 0.000000e+00 : f32
    %420 = vector.broadcast %cst_100 : f32 to vector<8x32xf32>
    %421 = arith.maximumf %419, %420 : vector<8x32xf32>
    %c264 = arith.constant 264 : index
    %c0_101 = arith.constant 0 : index
    %422 = vector.load %arg3[%c264, %c0_101] : memref<344x32xf32, #tpu.memory_space<vmem>>, vector<32x32xf32>
    %cst_102 = arith.constant dense<0.000000e+00> : vector<8x32xf32>
    %423 = tpu.matmul %421, %422, %cst_102 {dimension_numbers = #tpu.dot_dimension_numbers<[1], [0], [0], [1], [0, 0, 1, 1], [], []>} : vector<8x32xf32>, vector<32x32xf32>, vector<8x32xf32> -> vector<8x32xf32>
    %c296 = arith.constant 296 : index
    %c0_103 = arith.constant 0 : index
    %424 = vector.load %arg3[%c296, %c0_103] : memref<344x32xf32, #tpu.memory_space<vmem>>, vector<1x32xf32>
    %425 = vector.broadcast %424 : vector<1x32xf32> to vector<8x32xf32>
    %426 = arith.addf %423, %425 : vector<8x32xf32>
    %cst_104 = arith.constant 0.000000e+00 : f32
    %427 = vector.broadcast %cst_104 : f32 to vector<8x32xf32>
    %428 = arith.maximumf %426, %427 : vector<8x32xf32>
    %c304 = arith.constant 304 : index
    %c0_105 = arith.constant 0 : index
    %429 = vector.load %arg3[%c304, %c0_105] : memref<344x32xf32, #tpu.memory_space<vmem>>, vector<32x32xf32>
    %cst_106 = arith.constant dense<0.000000e+00> : vector<8x32xf32>
    %430 = tpu.matmul %428, %429, %cst_106 {dimension_numbers = #tpu.dot_dimension_numbers<[1], [0], [0], [1], [0, 0, 1, 1], [], []>} : vector<8x32xf32>, vector<32x32xf32>, vector<8x32xf32> -> vector<8x32xf32>
    %c336 = arith.constant 336 : index
    %c0_107 = arith.constant 0 : index
    %431 = vector.load %arg3[%c336, %c0_107] : memref<344x32xf32, #tpu.memory_space<vmem>>, vector<1x32xf32>
    %432 = vector.broadcast %431 : vector<1x32xf32> to vector<8x32xf32>
    %433 = arith.addf %430, %432 : vector<8x32xf32>
    %434 = vector.extract_strided_slice %433 {offsets = [0, 0], sizes = [2, 1], strides = [1, 1]} : vector<8x32xf32> to vector<2x1xf32>
    %c0_108 = arith.constant 0 : index
    %c0_109 = arith.constant 0 : index
    %435 = vector.load %arg4[%c0_108, %c0_109] : memref<2x1xf32, #tpu.memory_space<vmem>>, vector<2x1xf32>
    tpu.vector_store %arg4[%c0_108, %c0_109], %434 {strides = array<i32>} : memref<2x1xf32, #tpu.memory_space<vmem>>, vector<2x1xf32>,
    return
  }
}

</mosaic_0001>

<bundles_post_ra>
// kernel: forward.1
= control target key start
LH: loop header
LB: loop body
LE: loop exit
PB: predicated region body
PF: predicated region fallthrough
CT: control target
= control target key end

     0   :  { %vm54_vm0 = vcmask 1043456   ;;  %vm29_vm1 = vcmask 31744   ;;  %vm418_vm2 = vcmask 261120   ;;  %vm4888_vm3 = vmmov 0   ;;  %s4890_s28 = smov 64   ;;  %s4891_s29 = smov 32   ;;  %s5892_s1 = inlined_call_operand.vmem [shape: f32[136,32], index: 1, kind: input, shape index: {}]   ;;  %s5893_s0 = inlined_call_operand.vmem [shape: f32[64,4], index: 0, kind: input, shape index: {}]   ;;  %s5894_s2 = inlined_call_operand.vmem [shape: f32[144,128], index: 2, kind: input, shape index: {}]   ;;  %s5895_s3 = inlined_call_operand.vmem [shape: f32[344,32], index: 3, kind: input, shape index: {}]   ;;  %s5896_s4 = inlined_call_operand.vmem [shape: f32[2,1], index: 4, kind: output, shape index: {}]  }
   0x1   :  { %v25_v0 = vld [vmem:[%s5892_s1] sm:$0xf]  ;;  %v18_v2 = vld [vmem:[%s5893_s0 + $0x8] sm:$0xff]  ;;  %v19_v4 = vld [vmem:[%s5893_s0 + $0x10] sm:$0xff]  ;;  %vm3911_vm7 = vcmask 1024  }
   0x2   :  { %v17_v1 = vld [vmem:[%s5893_s0] sm:$0xff]  ;;  %4276 = vmatprep.subr.msk.mxu0 %vm54_vm0, %v25_v0  ;;  %v26_v3 = vld [vmem:[%s5892_s1 + $0x8] sm:$0xf]  ;;  %v27_v5 = vld [vmem:[%s5892_s1 + $0x10] sm:$0xf] }
   0x3   :  { %4278 = vmatprep.mubr.msk.f32.mxu0 %vm29_vm1, %v17_v1  ;;  %4277 = vmatpush3.msk.msra.mxu0 %vm54_vm0, %v25_v0  ;;  %v20_v6 = vld [vmem:[%s5893_s0 + $0x18] sm:$0xff]  ;;  %v21_v7 = vld [vmem:[%s5893_s0 + $0x20] sm:$0xff]  ;;  %v22_v8 = vld [vmem:[%s5893_s0 + $0x28] sm:$0xff] }
   0x4   :  { %4292 = vmatprep.mubr.msk.f32.mxu1 %vm29_vm1, %v17_v1  ;;  %4279 = vmatmul.mubr.msk.f32.vlgmr.msra.gmra.mxu0 %vm29_vm1, %v18_v2  ;;  %v23_v9 = vld [vmem:[%s5893_s0 + $0x30] sm:$0xff]  ;;  %v24_v10 = vld [vmem:[%s5893_s0 + $0x38] sm:$0xff]  ;;  %v406_v15 = vld [vmem:[%s5892_s1 + $0x28] sm:$0xff] }
   0x5   :  { %4304 = vmatprep.subr.msk.mxu0 %vm54_vm0, %v26_v3  ;;  %4281 = vmatprep.mubr.msk.f32.mxu0 %vm29_vm1, %v19_v4  ;;  %v408_v11 = vld [vmem:[%s5892_s1 + $0x38] sm:$0xff]  ;;  %v407_v12 = vld [vmem:[%s5892_s1 + $0x30] sm:$0xff]  ;;  %v414_v16 = vld [vmem:[%s5892_s1 + $0x68] sm:$0xff] }
   0x6   :  { %4305 = vmatpush3.msk.msra.mxu0 %vm54_vm0, %v26_v3  ;;  %4290 = vmatprep.subr.msk.mxu1 %vm54_vm0, %v27_v5  ;;  %v416_v13 = vld [vmem:[%s5892_s1 + $0x78] sm:$0xff]  ;;  %v415_v14 = vld [vmem:[%s5892_s1 + $0x70] sm:$0xff]  ;;  %v405_v17 = vld [vmem:[%s5892_s1 + $0x20] sm:$0xff] }
   0x7   :  { %4291 = vmatpush3.msk.msra.mxu1 %vm54_vm0, %v27_v5  ;;  %4338 = vmatprep.subr.mxu0 %v416_v13  ;;  %v413_v18 = vld [vmem:[%s5892_s1 + $0x60] sm:$0xff]  ;;  %v412_v19 = vld [vmem:[%s5892_s1 + $0x58] sm:$0xff]  ;;  %v411_v53 = vld [vmem:[%s5892_s1 + $0x50] sm:$0xff] }
   0x8   :  { %4282 = vmatmul.mubr.msk.f32.gmra.mxu0 %vm29_vm1, %v20_v6  ;;  %4293 = vmatmul.mubr.msk.f32.vlgmr.msra.gmra.mxu1 %vm29_vm1, %v18_v2  ;;  %v3935_v32 = vld [vmem:[%s5892_s1 + $0x18] ss:$0 sm:$0xff]  ;;  %v410_v60 = vld [vmem:[%s5892_s1 + $0x48] sm:$0xff] }
   0x9   :  { %4284 = vmatprep.mubr.msk.f32.mxu0 %vm29_vm1, %v21_v7  ;;  %4295 = vmatprep.mubr.msk.f32.mxu1 %vm29_vm1, %v19_v4 }
   0xa   :  { %4318 = vmatprep.subr.mxu1 %v408_v11 }
   0xb   :  { %4319 = vmatpush3.msra.mxu1 %v408_v11 }
   0xc   :  { %4285 = vmatmul.mubr.msk.f32.gmra.mxu0 %vm29_vm1, %v22_v8  ;;  %4296 = vmatmul.mubr.msk.f32.gmra.mxu1 %vm29_vm1, %v20_v6 }
   0xd   :  { %4287 = vmatprep.mubr.msk.f32.mxu0 %vm29_vm1, %v23_v9  ;;  %4298 = vmatprep.mubr.msk.f32.mxu1 %vm29_vm1, %v21_v7 }
   0xe   :  { %4320 = vmatprep.subr.mxu1 %v407_v12 }
   0xf   :  { %4321 = vmatpush3.msra.mxu1 %v407_v12 }
  0x10   :  { %4288 = vmatmul.mubr.msk.f32.gmra.mxu0 %vm29_vm1, %v24_v10  ;;  %4299 = vmatmul.mubr.msk.f32.gmra.mxu1 %vm29_vm1, %v22_v8 }
  0x11   :  { %4306 = vmatprep.mubr.msk.f32.mxu0 %vm29_vm1, %v17_v1  ;;  %4301 = vmatprep.mubr.msk.f32.mxu1 %vm29_vm1, %v23_v9 }
  0x12   :  { %4322 = vmatprep.subr.mxu1 %v406_v15 }
  0x13   :  { %4323 = vmatpush3.msra.mxu1 %v406_v15  ;;  %v793_v15 = vld [vmem:[%s5894_s2 + $0x10] sm:$0xff] }
  0x14   :  { %4307 = vmatmul.mubr.msk.f32.vlgmr.msra.gmra.mxu0 %vm29_vm1, %v18_v2  ;;  %4302 = vmatmul.mubr.msk.f32.gmra.mxu1 %vm29_vm1, %v24_v10 }
  0x15   :  { %4309 = vmatprep.mubr.msk.f32.mxu0 %vm29_vm1, %v19_v4  ;;  %4339 = vmatpush3.msra.mxu0 %v416_v13 }
  0x16   :  { %4340 = vmatprep.subr.mxu0 %v415_v14  ;;  %4324 = vmatprep.subr.mxu1 %v405_v17 }
  0x17   :  { %4341 = vmatpush3.msra.mxu0 %v415_v14  ;;  %4325 = vmatpush3.msra.mxu1 %v405_v17  ;;  %v794_v14 = vld [vmem:[%s5894_s2 + $0x18] sm:$0xff]  ;;  %v4887_v17 = vmov 0.0  }
  0x18   :  { %4310 = vmatmul.mubr.msk.f32.gmra.mxu0 %vm29_vm1, %v20_v6  ;;  %4342 = vmatprep.subr.mxu0 %v414_v16  ;;  %v409_v6 = vld [vmem:[%s5892_s1 + $0x40] sm:$0xff] }
  0x19   :  { %4312 = vmatprep.mubr.msk.f32.mxu0 %vm29_vm1, %v21_v7  ;;  %4343 = vmatpush3.msra.mxu0 %v414_v16  ;;  %v5052_v16 = vld [vmem:[%s5894_s2 + $0x38] sm:$0xff] }
  0x1a   :  { %4344 = vmatprep.subr.mxu0 %v413_v18  ;;  %4358 = vmatprep.subr.mxu1 %v412_v19 }
  0x1b   :  { %4345 = vmatpush3.msra.mxu0 %v413_v18  ;;  %v792_v18 = vld [vmem:[%s5894_s2 + $0x8] sm:$0xff] }
  0x1c   :  { %4313 = vmatmul.mubr.msk.f32.gmra.mxu0 %vm29_vm1, %v22_v8  ;;  %4378 = vmatprep.subr.mxu0 %v794_v14 }
  0x1d   :  { %4315 = vmatprep.mubr.msk.f32.mxu0 %vm29_vm1, %v23_v9 }
  0x20   :  { %4316 = vmatmul.mubr.msk.f32.gmra.mxu0 %vm29_vm1, %v24_v10 }
  0xc4   :  { %v4280_v20 = vpop.f32.mrf.mxu0 }
  0xc6   :  { %v124_v21 = vpop.f32.mrf.mxu0 }
  0xc8   :  { %v4283_v22 = vpop.f32.mrf.mxu0  ;;  %v4294_v23 = vpop.f32.mrf.mxu1 }
  0xca   :  { %v134_v24 = vpop.f32.mrf.mxu0  ;;  %v231_v25 = vpop.f32.mrf.mxu1 }
  0xcc   :  { %v4286_v26 = vpop.f32.mrf.mxu0  ;;  %v4297_v27 = vpop.f32.mrf.mxu1 }
  0xce   :  { %v144_v28 = vpop.f32.mrf.mxu0  ;;  %v240_v29 = vpop.f32.mrf.mxu1 }
  0xd0   :  { %v4289_v30 = vpop.f32.mrf.mxu0  ;;  %v4300_v33 = vpop.f32.mrf.mxu1 }
  0xd2   :  { %v154_v31 = vpop.f32.mrf.mxu0  ;;  %v250_v39 = vpop.f32.mrf.mxu1 }
  0xd4   :  { %v4308_v34 = vpop.f32.mrf.mxu0  ;;  %v4303_v49 = vpop.f32.mrf.mxu1 }
  0xd5   :  { %v348_v35 = vadd.f32 %v4308_v34, %v3935_v32 }
  0xd6   :  { %v342_v36 = vpop.f32.mrf.mxu0  ;;  %v260_v58 = vpop.f32.mrf.mxu1 }
  0xd7   :  { %v343_v37 = vadd.f32 %v3935_v32, %v342_v36  ;;  %v382_v38 = vadd.f32 %v348_v35, %v124_v21  ;;  %v5073_v21 = vld [vmem:[%s5894_s2 + $0x28] sm:$0xff]  ;;  %v3961_v35 = vld [vmem:[%s5892_s1 + $0x80] ss:$0 sm:$0xff] }
  0xd8   :  { %v4311_v40 = vpop.f32.mrf.mxu0 }
  0xd9   :  { %v389_v41 = vadd.f32 %v4294_v23, %v343_v37  ;;  %v390_v42 = vadd.f32 %v382_v38, %v240_v29  ;;  %v358_v43 = vadd.f32 %v4311_v40, %v3935_v32 }
  0xda   :  { %v352_v44 = vpop.f32.mrf.mxu0 }
  0xdb   :  { %v397_v45 = vmax.f32 %v389_v41, 0.0  ;;  %v398_v46 = vmax.f32 %v390_v42, 0.0  ;;  %v353_v47 = vadd.f32 %v3935_v32, %v352_v44  ;;  %v384_v48 = vadd.f32 %v358_v43, %v134_v24 }
  0xdc   :  { %v4314_v50 = vpop.f32.mrf.mxu0 }
  0xdd   :  { %v383_v51 = vadd.f32 %v4280_v20, %v353_v47  ;;  %v368_v52 = vadd.f32 %v4314_v50, %v3935_v32  ;;  %4326 = vmatprep.mubr.msk.f32.mxu1 %vm418_vm2, %v397_v45  ;;  %4346 = vmatprep.mubr.msk.f32.mxu0 %vm418_vm2, %v397_v45  ;;  %v392_v54 = vadd.f32 %v384_v48, %v250_v39  ;;  %v791_v20 = vld [vmem:[%s5894_s2] sm:$0xff] }
  0xde   :  { %v362_v55 = vpop.f32.mrf.mxu0  ;;  %4327 = vmatmul.mubr.msk.f32.vlgmr.msra.gmra.mxu1 %vm418_vm2, %v398_v46  ;;  %4347 = vmatmul.mubr.msk.f32.vlgmr.msra.gmra.mxu0 %vm418_vm2, %v398_v46 }
  0xdf   :  { %v391_v56 = vadd.f32 %v4297_v27, %v383_v51  ;;  %v363_v57 = vadd.f32 %v3935_v32, %v362_v55  ;;  %v386_v59 = vadd.f32 %v368_v52, %v144_v28  ;;  %4359 = vmatpush3.msra.mxu1 %v412_v19  ;;  %v400_v0 = vmax.f32 %v392_v54, 0.0  ;;  %4379 = vmatpush3.msra.mxu0 %v794_v14  ;;  %v5063_v19 = vld [vmem:[%s5894_s2 + $0x30] sm:$0xff] }
  0xe0   :  { %v4317_v61 = vpop.f32.mrf.mxu0  ;;  %4360 = vmatprep.subr.mxu1 %v411_v53  ;;  %4380 = vmatprep.subr.mxu0 %v793_v15 }
  0xe1   :  { %v399_v62 = vmax.f32 %v391_v56, 0.0  ;;  %v385_v63 = vadd.f32 %v4283_v22, %v363_v57  ;;  %4361 = vmatpush3.msra.mxu1 %v411_v53  ;;  %v394_v1 = vadd.f32 %v386_v59, %v260_v58  ;;  %v378_v2 = vadd.f32 %v4317_v61, %v3935_v32  ;;  %4381 = vmatpush3.msra.mxu0 %v793_v15  ;;  %v5080_v22 = vld [vmem:[%s5894_s2 + $0x20] sm:$0xff] }
  0xe2   :  { %v372_v3 = vpop.f32.mrf.mxu0  ;;  %4362 = vmatprep.subr.mxu1 %v410_v60  ;;  %4382 = vmatprep.subr.mxu0 %v792_v18 }
  0xe3   :  { %v393_v4 = vadd.f32 %v4300_v33, %v385_v63  ;;  %v373_v5 = vadd.f32 %v3935_v32, %v372_v3  ;;  %4329 = vmatprep.mubr.msk.f32.mxu1 %vm418_vm2, %v399_v62  ;;  %4349 = vmatprep.mubr.msk.f32.mxu0 %vm418_vm2, %v399_v62  ;;  %v402_v9 = vmax.f32 %v394_v1, 0.0  ;;  %v388_v10 = vadd.f32 %v378_v2, %v154_v31 }
  0xe4   :  { %4330 = vmatmul.mubr.msk.f32.gmra.mxu1 %vm418_vm2, %v400_v0  ;;  %4350 = vmatmul.mubr.msk.f32.gmra.mxu0 %vm418_vm2, %v400_v0 }
  0xe5   :  { %v401_v7 = vmax.f32 %v393_v4, 0.0  ;;  %v387_v8 = vadd.f32 %v4286_v26, %v373_v5  ;;  %4363 = vmatpush3.msra.mxu1 %v410_v60  ;;  %v404_v13 = vmax.f32 %v388_v10, 0.0  ;;  %4383 = vmatpush3.msra.mxu0 %v792_v18  ;;  %v784_v18 = vlaneseq }
  0xe6   :  { %4364 = vmatprep.subr.mxu1 %v409_v6  ;;  %4384 = vmatprep.subr.mxu0 %v791_v20 }
  0xe7   :  { %v395_v11 = vadd.f32 %v4303_v49, %v387_v8  ;;  %4332 = vmatprep.mubr.msk.f32.mxu1 %vm418_vm2, %v401_v7  ;;  %4352 = vmatprep.mubr.msk.f32.mxu0 %vm418_vm2, %v401_v7 }
  0xe8   :  { %4333 = vmatmul.mubr.msk.f32.gmra.mxu1 %vm418_vm2, %v402_v9  ;;  %4353 = vmatmul.mubr.msk.f32.gmra.mxu0 %vm418_vm2, %v402_v9 }
  0xe9   :  { %v403_v12 = vmax.f32 %v395_v11, 0.0  ;;  %4365 = vmatpush3.msra.mxu1 %v409_v6  ;;  %4385 = vmatpush3.msra.mxu0 %v791_v20  ;;  %v785_v20 = vand.u32 127, %v784_v18 }
  0xea   :  { %4398 = vmatprep.subr.mxu1 %v4887_v17  ;;  %4420 = vmatprep.subr.mxu0 %v4887_v17 }
  0xeb   :  { %4335 = vmatprep.mubr.msk.f32.mxu1 %vm418_vm2, %v403_v12  ;;  %4355 = vmatprep.mubr.msk.f32.mxu0 %vm418_vm2, %v403_v12  ;;  %vm786_vm4 = vcmp.ge.s32.totalorder %v785_v20, 64  ;;  %vm787_vm5 = vcmp.lt.s32.totalorder %v785_v20, 96 }
  0xec   :  { %4336 = vmatmul.mubr.msk.f32.gmra.mxu1 %vm418_vm2, %v404_v13  ;;  %4356 = vmatmul.mubr.msk.f32.gmra.mxu0 %vm418_vm2, %v404_v13  ;;  %vm5116_vm6 = vmand %vm786_vm4, %vm787_vm5 }
  0xed   :  { %4366 = vmatprep.mubr.msk.f32.mxu1 %vm418_vm2, %v397_v45 }
  0xf0   :  { %4367 = vmatmul.mubr.msk.f32.vlgmr.msra.gmra.mxu1 %vm418_vm2, %v398_v46 }
  0xf1   :  { %4369 = vmatprep.mubr.msk.f32.mxu1 %vm418_vm2, %v399_v62  ;;  %4399 = vmatpush3.msra.mxu1 %v5052_v16 }
  0xf2   :  { %4400 = vmatprep.subr.mxu1 %v4887_v17 }
  0xf3   :  { %4401 = vmatpush3.msra.mxu1 %v5063_v19 }
  0xf4   :  { %4370 = vmatmul.mubr.msk.f32.gmra.mxu1 %vm418_vm2, %v400_v0  ;;  %4402 = vmatprep.subr.mxu1 %v4887_v17 }
  0xf5   :  { %4372 = vmatprep.mubr.msk.f32.mxu1 %vm418_vm2, %v401_v7  ;;  %4403 = vmatpush3.msra.mxu1 %v5073_v21 }
  0xf6   :  { %4404 = vmatprep.subr.mxu1 %v4887_v17 }
  0xf7   :  { %4405 = vmatpush3.msra.mxu1 %v5080_v22 }
  0xf8   :  { %4373 = vmatmul.mubr.msk.f32.gmra.mxu1 %vm418_vm2, %v402_v9  ;;  %4409 = vmatprep.subr.mxu1 %v4887_v17 }
  0xf9   :  { %4375 = vmatprep.mubr.msk.f32.mxu1 %vm418_vm2, %v403_v12 }
  0xfc   :  { %4376 = vmatmul.mubr.msk.f32.gmra.mxu1 %vm418_vm2, %v404_v13 }
  0xfd   :  { %4406 = vmatprep.mubr.msk.f32.mxu1 %vm4888_vm3, %v4887_v17 }
 0x100   :  { %4407 = vmatmul.mubr.f32.vlgmr.msra.gmra.mxu1 %v4887_v17 }
 0x101   :  { %4410 = vmatpush3.msra.mxu1 %v5052_v16  ;;  %4417 = vmatprep.mubr.msk.f32.mxu1 %vm4888_vm3, %v4887_v17 }
 0x102   :  { %4411 = vmatprep.subr.mxu1 %v4887_v17 }
 0x103   :  { %4412 = vmatpush3.msra.mxu1 %v5063_v19 }
 0x104   :  { %4413 = vmatprep.subr.mxu1 %v4887_v17 }
 0x105   :  { %4414 = vmatpush3.msra.mxu1 %v5073_v21 }
 0x106   :  { %4415 = vmatprep.subr.mxu1 %v4887_v17 }
 0x107   :  { %4416 = vmatpush3.msra.mxu1 %v5080_v22 }
 0x108   :  { %4431 = vmatprep.subr.mxu1 %v4887_v17 }
 0x19e   :  { %v4328_v23 = vpop.f32.mrf.mxu1  ;;  %v4348_v24 = vpop.f32.mrf.mxu0 }
 0x1a0   :  { %v613_v25 = vpop.f32.mrf.mxu0  ;;  %v509_v26 = vpop.f32.mrf.mxu1 }
 0x1a4   :  { %v4331_v27 = vpop.f32.mrf.mxu1  ;;  %v4351_v30 = vpop.f32.mrf.mxu0 }
 0x1a6   :  { %v519_v28 = vpop.f32.mrf.mxu1  ;;  %v622_v33 = vpop.f32.mrf.mxu0 }
 0x1a8   :  { %v4334_v29 = vpop.f32.mrf.mxu1  ;;  %v4354_v37 = vpop.f32.mrf.mxu0 }
 0x1aa   :  { %v529_v31 = vpop.f32.mrf.mxu1  ;;  %v632_v43 = vpop.f32.mrf.mxu0 }
 0x1ac   :  { %v4337_v32 = vpop.f32.mrf.mxu1  ;;  %v4357_v53 = vpop.f32.mrf.mxu0 }
 0x1ae   :  { %v539_v34 = vpop.f32.mrf.mxu1  ;;  %v642_v62 = vpop.f32.mrf.mxu0 }
 0x1b0   :  { %v4368_v36 = vpop.f32.mrf.mxu1 }
 0x1b1   :  { %v727_v38 = vadd.f32 %v4368_v36, %v3961_v35 }
 0x1b2   :  { %v721_v39 = vpop.f32.mrf.mxu1 }
 0x1b3   :  { %v761_v40 = vadd.f32 %v727_v38, %v509_v26  ;;  %v722_v41 = vadd.f32 %v3961_v35, %v721_v39 }
 0x1b4   :  { %v4371_v42 = vpop.f32.mrf.mxu1 }
 0x1b5   :  { %v769_v44 = vadd.f32 %v761_v40, %v622_v33  ;;  %v768_v45 = vadd.f32 %v4348_v24, %v722_v41  ;;  %v737_v46 = vadd.f32 %v4371_v42, %v3961_v35 }
 0x1b6   :  { %v731_v47 = vpop.f32.mrf.mxu1 }
 0x1b7   :  { %v777_v48 = vmax.f32 %v769_v44, 0.0  ;;  %v776_v49 = vmax.f32 %v768_v45, 0.0  ;;  %v763_v50 = vadd.f32 %v737_v46, %v519_v28  ;;  %v732_v51 = vadd.f32 %v3961_v35, %v731_v47 }
 0x1b8   :  { %v4374_v52 = vpop.f32.mrf.mxu1  ;;  %v5138_v47 = vsel %vm5116_vm6, 1.0, %v4887_v17 }
 0x1b9   :  { %v762_v54 = vadd.f32 %v4328_v23, %v732_v51  ;;  %v747_v55 = vadd.f32 %v4374_v52, %v3961_v35  ;;  %4386 = vmatprep.mubr.msk.f32.mxu0 %vm418_vm2, %v776_v49  ;;  %v771_v56 = vadd.f32 %v763_v50, %v632_v43  ;;  %v3971_v23 = vld [vmem:[%s5894_s2 + $0x40] ss:$0 sm:$0xff] }
 0x1ba   :  { %v741_v57 = vpop.f32.mrf.mxu1  ;;  %4387 = vmatmul.mubr.msk.f32.vlgmr.msra.gmra.mxu0 %vm418_vm2, %v777_v48 }
 0x1bb   :  { %v770_v58 = vadd.f32 %v4351_v30, %v762_v54  ;;  %v765_v59 = vadd.f32 %v747_v55, %v529_v31  ;;  %v742_v60 = vadd.f32 %v3961_v35, %v741_v57  ;;  %v779_v1 = vmax.f32 %v771_v56, 0.0  ;;  %v5150_v55 = vld [vmem:[%s5894_s2 + $0x60] sm:$0xff]  ;;  %v5155_v56 = vld [vmem:[%s5894_s2 + $0x58] sm:$0xff]  ;;  %v5162_v57 = vld [vmem:[%s5894_s2 + $0x50] sm:$0xff] }
 0x1bc   :  { %v4377_v61 = vpop.f32.mrf.mxu1  ;;  %4421 = vmatpush3.msra.mxu0 %v5150_v55 }
 0x1bd   :  { %v778_v63 = vmax.f32 %v770_v58, 0.0  ;;  %v764_v0 = vadd.f32 %v4331_v27, %v742_v60  ;;  %v773_v2 = vadd.f32 %v765_v59, %v642_v62  ;;  %v757_v3 = vadd.f32 %v4377_v61, %v3961_v35  ;;  %4422 = vmatprep.subr.mxu0 %v4887_v17  ;;  %v5169_v58 = vld [vmem:[%s5894_s2 + $0x48] sm:$0xff]  ;;  %v5180_v62 = vld [vmem:[%s5894_s2 + $0x80] sm:$0xff] }
 0x1be   :  { %v751_v4 = vpop.f32.mrf.mxu1  ;;  %4423 = vmatpush3.msra.mxu0 %v5155_v56 }
 0x1bf   :  { %v772_v5 = vadd.f32 %v4354_v37, %v764_v0  ;;  %v752_v6 = vadd.f32 %v3961_v35, %v751_v4  ;;  %4389 = vmatprep.mubr.msk.f32.mxu0 %vm418_vm2, %v778_v63  ;;  %v781_v9 = vmax.f32 %v773_v2, 0.0  ;;  %v767_v10 = vadd.f32 %v757_v3, %v539_v34  ;;  %4424 = vmatprep.subr.mxu0 %v4887_v17  ;;  %v5187_v0 = vld [vmem:[%s5894_s2 + $0x78] sm:$0xff]  ;;  %v5205_v2 = vld [vmem:[%s5894_s2 + $0x68] sm:$0xff] }
 0x1c0   :  { %4390 = vmatmul.mubr.msk.f32.gmra.mxu0 %vm418_vm2, %v779_v1  ;;  %v1015_v14 = vpop.f32.mrf.mxu1  ;;  %v5196_v1 = vld [vmem:[%s5894_s2 + $0x70] sm:$0xff] }
 0x1c1   :  { %v780_v7 = vmax.f32 %v772_v5, 0.0  ;;  %v766_v8 = vadd.f32 %v4334_v29, %v752_v6  ;;  %v783_v13 = vmax.f32 %v767_v10, 0.0  ;;  %v4889_v29 = vmov 1.0   ;;  %4425 = vmatpush3.msra.mxu0 %v5162_v57  ;;  %v5237_v10 = vld [vmem:[%s5894_s2 + $0x88] ss:$0 sm:$0xff] }
 0x1c2   :  { %v4408_v15 = vpop.f32.mrf.mxu1  ;;  %v5122_v30 = vsel %vm5116_vm6, 2.0, %v4889_v29  ;;  %4426 = vmatprep.subr.mxu0 %v4887_v17 }
 0x1c3   :  { %v774_v11 = vadd.f32 %v4357_v53, %v766_v8  ;;  %4392 = vmatprep.mubr.msk.f32.mxu0 %vm418_vm2, %v780_v7  ;;  %4427 = vmatpush3.msra.mxu0 %v5169_v58 }
 0x1c4   :  { %4393 = vmatmul.mubr.msk.f32.gmra.mxu0 %vm418_vm2, %v781_v9  ;;  %4442 = vmatprep.subr.mxu0 %v4887_v17 }
 0x1c5   :  { %v782_v12 = vmax.f32 %v774_v11, 0.0 }
 0x1c7   :  { %4395 = vmatprep.mubr.msk.f32.mxu0 %vm418_vm2, %v782_v12 }
 0x1c8   :  { %4396 = vmatmul.mubr.msk.f32.gmra.mxu0 %vm418_vm2, %v783_v13 }
 0x1c9   :  { %4428 = vmatprep.mubr.msk.f32.mxu0 %vm4888_vm3, %v4887_v17 }
 0x27a   :  { %v4388_v24 = vpop.f32.mrf.mxu0 }
 0x27b   :  { %v5114_v25 = vadd.f32 %v4388_v24, %v3971_v23 }
 0x27c   :  { %v907_v27 = vpop.f32.mrf.mxu0 }
 0x27d   :  { %v908_v28 = vadd.f32 %v3971_v23, %v907_v27 }
 0x27f   :  { %v1019_v31 = vadd.f32 %v1015_v14, %v908_v28 }
 0x280   :  { %v4391_v32 = vpop.f32.mrf.mxu0 }
 0x281   :  { %v1020_v33 = vmul.f32 %v1019_v31, %v5122_v30  ;;  %v5125_v34 = vadd.f32 %v4391_v32, %v3971_v23 }
 0x282   :  { %v917_v35 = vpop.f32.mrf.mxu0 }
 0x283   :  { %v3980_v36 = vmul.f32 -1.442695, %v1020_v33  ;;  %v5127_v37 = vadd.f32 %v3971_v23, %v917_v35 }
 0x284   :  { %v4394_v38 = vpop.f32.mrf.mxu0 }
 0x285   :  { %4777 = vpow2.f32 %v3980_v36  ;;  %v5129_v39 = vadd.f32 %v4394_v38, %v3971_v23 }
 0x286   :  { %v927_v40 = vpop.f32.mrf.mxu0 }
 0x287   :  { %v5131_v41 = vadd.f32 %v3971_v23, %v927_v40 }
 0x288   :  { %v4397_v42 = vpop.f32.mrf.mxu0 }
 0x289   :  { %v5133_v43 = vadd.f32 %v4397_v42, %v3971_v23 }
 0x28a   :  { %v5230_v3 = vpop.f32.mrf.mxu0 }
 0x292   :  { %v4778_v44 = vpop.eup %4777 }
 0x293   :  { %v1024_v45 = vadd.f32 1.0, %v4778_v44 }
 0x295   :  { %4779 = vrcp.f32 %v1024_v45 }
 0x2a2   :  { %v4780_v46 = vpop.eup %4779 }
 0x2a3   :  { %v1027_v48 = vmul.f32 %v4780_v46, %v5122_v30 }
 0x2a5   :  { %v1028_v49 = vsub.f32 %v1027_v48, %v5138_v47 }
 0x2a7   :  { %1031 = vrot.lane.b32.xlu0 %v1028_v49, %s4890_s28  ;;  %v1029_v52 = vmul.f32 0.0, %v1028_v49 }
 0x319   :  { %v1032_v50 = vpop.permute.xlu0 %1031 }
 0x31a   :  { %v1034_v51 = vmul.f32 %v1032_v50, %v1028_v49 }
 0x31c   :  { %1036 = vrot.lane.b32.xlu0 %v1034_v51, %s4891_s29 }
 0x38e   :  { %v1037_v53 = vpop.permute.xlu0 %1036 }
 0x38f   :  { %v5144_v54 = vadd.f32 %v1037_v53, %v1029_v52 }
 0x391   :  { %4781 = vtanh.f32 %v5144_v54 }
 0x39e   :  { %v4782_v59 = vpop.eup %4781 }
 0x39f   :  { %1042 = vrot.lane.b32.xlu1 %v4782_v59, %s4890_s28 }
 0x411   :  { %v1043_v60 = vpop.permute.xlu1 %1042 }
 0x412   :  { %v1045_v61 = vmul.f32 %v1043_v60, %v1028_v49 }
 0x414   :  { %1047 = vrot.lane.b32.xlu1 %v1045_v61, %s4891_s29  ;;  %v1318_v61 = vld [vmem:[%s5895_s3 + $0x18] sm:$0xff] }
 0x486   :  { %v1048_v63 = vpop.permute.xlu1 %1047 }
 0x487   :  { %4418 = vmatmul.mubr.msk.f32.vlgmr.msra.gmra.mxu1 %vm418_vm2, %v1048_v63  ;;  %4429 = vmatmul.mubr.msk.f32.vlgmr.msra.gmra.mxu0 %vm418_vm2, %v1048_v63 }
 0x488   :  { %4432 = vmatpush3.msra.mxu1 %v5180_v62  ;;  %4439 = vmatprep.mubr.msk.f32.mxu1 %vm4888_vm3, %v4887_v17 }
 0x489   :  { %4433 = vmatprep.subr.mxu1 %v4887_v17  ;;  %4443 = vmatpush3.msra.mxu0 %v5052_v16 }
 0x48a   :  { %4434 = vmatpush3.msra.mxu1 %v5187_v0  ;;  %4444 = vmatprep.subr.mxu0 %v4887_v17 }
 0x48b   :  { %4435 = vmatprep.subr.mxu1 %v4887_v17  ;;  %4445 = vmatpush3.msra.mxu0 %v5063_v19 }
 0x48c   :  { %4436 = vmatpush3.msra.mxu1 %v5196_v1  ;;  %4446 = vmatprep.subr.mxu0 %v4887_v17 }
 0x48d   :  { %4437 = vmatprep.subr.mxu1 %v4887_v17  ;;  %4447 = vmatpush3.msra.mxu0 %v5073_v21 }
 0x48e   :  { %4438 = vmatpush3.msra.mxu1 %v5205_v2  ;;  %4448 = vmatprep.subr.mxu0 %v4887_v17 }
 0x48f   :  { %4440 = vmatmul.mubr.f32.vlgmr.msra.gmra.mxu1 %v4887_v17  ;;  %4453 = vmatprep.subr.mxu1 %v4887_v17 }
 0x490   :  { %4454 = vmatpush3.msra.mxu1 %v5150_v55  ;;  %4449 = vmatpush3.msra.mxu0 %v5080_v22 }
 0x491   :  { %4455 = vmatprep.subr.mxu1 %v4887_v17  ;;  %4450 = vmatprep.mubr.msk.f32.mxu0 %vm4888_vm3, %v4887_v17 }
 0x492   :  { %4456 = vmatpush3.msra.mxu1 %v5155_v56  ;;  %4461 = vmatprep.mubr.msk.f32.mxu1 %vm4888_vm3, %v4887_v17 }
 0x493   :  { %4457 = vmatprep.subr.mxu1 %v4887_v17  ;;  %4464 = vmatprep.subr.mxu0 %v4887_v17 }
 0x494   :  { %4458 = vmatpush3.msra.mxu1 %v5162_v57 }
 0x495   :  { %4459 = vmatprep.subr.mxu1 %v4887_v17 }
 0x496   :  { %4460 = vmatpush3.msra.mxu1 %v5169_v58 }
 0x497   :  { %4475 = vmatprep.subr.mxu1 %v4887_v17 }
 0x547   :  { %v1117_v4 = vpop.f32.mrf.mxu1  ;;  %v1214_v5 = vpop.f32.mrf.mxu0 }
 0x548   :  { %v1121_v6 = vadd.f32 %v1117_v4, %v5114_v25  ;;  %v1215_v12 = vadd.f32 %v5237_v10, %v1214_v5  ;;  %v1317_v4 = vld [vmem:[%s5895_s3 + $0x10] sm:$0xff]  ;;  %v1316_v5 = vld [vmem:[%s5895_s3 + $0x8] sm:$0xff] }
 0x549   :  { %v4419_v7 = vpop.f32.mrf.mxu1  ;;  %v4430_v8 = vpop.f32.mrf.mxu0 }
 0x54a   :  { %v1122_v9 = vmul.f32 %v1121_v6, %v5122_v30  ;;  %v1315_v6 = vld [vmem:[%s5895_s3] sm:$0xff] }
 0x54c   :  { %v3982_v11 = vmul.f32 -1.442695, %v1122_v9 }
 0x54e   :  { %4783 = vpow2.f32 %v3982_v11 }
 0x54f   :  { %v1284_v13 = vpop.f32.mrf.mxu1 }
 0x550   :  { %v1288_v14 = vadd.f32 %v1284_v13, %v1215_v12 }
 0x551   :  { %v4441_v15 = vpop.f32.mrf.mxu1 }
 0x552   :  { %v1289_v18 = vmul.f32 %v1288_v14, %v5122_v30 }
 0x554   :  { %v3984_v20 = vmul.f32 -1.442695, %v1289_v18 }
 0x556   :  { %4785 = vpow2.f32 %v3984_v20 }
 0x55b   :  { %v4784_v23 = vpop.eup %4783 }
 0x55c   :  { %v1126_v24 = vadd.f32 1.0, %v4784_v23 }
 0x55e   :  { %4787 = vrcp.f32 %v1126_v24 }
 0x563   :  { %v4786_v25 = vpop.eup %4785 }
 0x564   :  { %v1293_v26 = vadd.f32 1.0, %v4786_v25 }
 0x566   :  { %4789 = vrcp.f32 %v1293_v26 }
 0x56b   :  { %v4788_v27 = vpop.eup %4787 }
 0x56c   :  { %v1129_v28 = vmul.f32 %v4788_v27, %v5122_v30 }
 0x56e   :  { %v1130_v29 = vsub.f32 %v1129_v28, %v5138_v47 }
 0x570   :  { %1133 = vrot.lane.b32.xlu0 %v1130_v29, %s4890_s28  ;;  %v1131_v42 = vmul.f32 %v1130_v29, %v5144_v54 }
 0x573   :  { %v4790_v31 = vpop.eup %4789 }
 0x574   :  { %v1296_v32 = vmul.f32 %v4790_v31, %v5122_v30 }
 0x576   :  { %v1297_v33 = vsub.f32 %v1296_v32, %v5138_v47 }
 0x578   :  { %1300 = vrot.lane.b32.xlu1 %v1297_v33, %s4890_s28  ;;  %v1298_v46 = vmul.f32 0.0, %v1297_v33 }
 0x5e2   :  { %v1134_v35 = vpop.permute.xlu0 %1133 }
 0x5e3   :  { %v1136_v36 = vmul.f32 %v1134_v35, %v1130_v29 }
 0x5e5   :  { %1138 = vrot.lane.b32.xlu0 %v1136_v36, %s4891_s29 }
 0x5ea   :  { %v1301_v38 = vpop.permute.xlu1 %1300 }
 0x5eb   :  { %v1303_v40 = vmul.f32 %v1301_v38, %v1297_v33 }
 0x5ed   :  { %1305 = vrot.lane.b32.xlu1 %v1303_v40, %s4891_s29 }
 0x657   :  { %v1139_v44 = vpop.permute.xlu0 %1138 }
 0x658   :  { %v5250_v45 = vadd.f32 %v1139_v44, %v1131_v42 }
 0x65a   :  { %4791 = vtanh.f32 %v5250_v45 }
 0x65f   :  { %v1306_v48 = vpop.permute.xlu1 %1305 }
 0x660   :  { %v5253_v49 = vadd.f32 %v1306_v48, %v1298_v46 }
 0x662   :  { %4793 = vtanh.f32 %v5253_v49 }
 0x667   :  { %v4792_v50 = vpop.eup %4791 }
 0x668   :  { %1144 = vrot.lane.b32.xlu0 %v4792_v50, %s4890_s28 }
 0x66f   :  { %v4794_v51 = vpop.eup %4793 }
 0x670   :  { %1311 = vrot.lane.b32.xlu1 %v4794_v51, %s4890_s28 }
 0x6da   :  { %v1145_v52 = vpop.permute.xlu0 %1144 }
 0x6db   :  { %v1147_v53 = vmul.f32 %v1145_v52, %v1130_v29 }
 0x6dd   :  { %1320 = vrot.lane.b32.xlu0 %v1147_v53, %s4891_s29 }
 0x6e2   :  { %v1312_v54 = vpop.permute.xlu1 %1311 }
 0x6e3   :  { %v1314_v59 = vmul.f32 %v1312_v54, %v1297_v33 }
 0x6e5   :  { %1492 = vrot.lane.b32.xlu1 %v1314_v59, %s4891_s29 }
 0x74f   :  { %v1321_v60 = vpop.permute.xlu0 %1320 }
 0x750   :  { %4451 = vmatmul.mubr.msk.f32.vlgmr.msra.gmra.mxu0 %vm418_vm2, %v1321_v60  ;;  %4462 = vmatmul.mubr.msk.f32.vlgmr.msra.gmra.mxu1 %vm418_vm2, %v1321_v60  ;;  %v1596_v60 = vld [vmem:[%s5895_s3 + $0x38] sm:$0xff] }
 0x751   :  { %4465 = vmatpush3.msra.mxu0 %v5180_v62  ;;  %4472 = vmatprep.mubr.msk.f32.mxu0 %vm4888_vm3, %v4887_v17 }
 0x752   :  { %4466 = vmatprep.subr.mxu0 %v4887_v17  ;;  %4483 = vmatprep.mubr.msk.f32.mxu1 %vm4888_vm3, %v4887_v17 }
 0x753   :  { %4467 = vmatpush3.msra.mxu0 %v5187_v0  ;;  %4476 = vmatpush3.msra.mxu1 %v1596_v60 }
 0x754   :  { %4468 = vmatprep.subr.mxu0 %v4887_v17  ;;  %4477 = vmatprep.subr.mxu1 %v4887_v17 }
 0x755   :  { %4469 = vmatpush3.msra.mxu0 %v5196_v1 }
 0x756   :  { %4470 = vmatprep.subr.mxu0 %v4887_v17 }
 0x757   :  { %4471 = vmatpush3.msra.mxu0 %v5205_v2  ;;  %v1493_v63 = vpop.permute.xlu1 %1492 }
 0x758   :  { %4473 = vmatmul.mubr.msk.f32.vlgmr.msra.gmra.mxu0 %vm418_vm2, %v1493_v63  ;;  %4486 = vmatprep.subr.mxu0 %v4887_v17 }
 0x759   :  { %4487 = vmatpush3.msra.mxu0 %v1318_v61  ;;  %4494 = vmatprep.mubr.msk.f32.mxu0 %vm4888_vm3, %v4887_v17 }
 0x75a   :  { %4488 = vmatprep.subr.mxu0 %v4887_v17 }
 0x75b   :  { %4489 = vmatpush3.msra.mxu0 %v1317_v4  ;;  %v1593_v4 = vld [vmem:[%s5895_s3 + $0x20] sm:$0xff] }
 0x75c   :  { %4490 = vmatprep.subr.mxu0 %v4887_v17 }
 0x75d   :  { %4491 = vmatpush3.msra.mxu0 %v1316_v5 }
 0x75e   :  { %4492 = vmatprep.subr.mxu0 %v4887_v17 }
 0x75f   :  { %4493 = vmatpush3.msra.mxu0 %v1315_v6 }
 0x760   :  { %4495 = vmatmul.mubr.msk.f32.vlgmr.msra.gmra.mxu0 %vm418_vm2, %v1493_v63  ;;  %4508 = vmatprep.subr.mxu0 %v4887_v17  ;;  %v1594_v63 = vld [vmem:[%s5895_s3 + $0x28] sm:$0xff] }
 0x761   :  { %4509 = vmatpush3.msra.mxu0 %v5150_v55  ;;  %4516 = vmatprep.mubr.msk.f32.mxu0 %vm4888_vm3, %v4887_v17 }
 0x762   :  { %4510 = vmatprep.subr.mxu0 %v4887_v17 }
 0x763   :  { %4511 = vmatpush3.msra.mxu0 %v5155_v56 }
 0x764   :  { %4512 = vmatprep.subr.mxu0 %v4887_v17 }
 0x765   :  { %4513 = vmatpush3.msra.mxu0 %v5162_v57 }
 0x766   :  { %4514 = vmatprep.subr.mxu0 %v4887_v17 }
 0x767   :  { %4515 = vmatpush3.msra.mxu0 %v5169_v58 }
 0x768   :  { %4530 = vmatprep.subr.mxu0 %v4887_v17 }
 0x810   :  { %v1390_v7 = vpop.f32.mrf.mxu0  ;;  %v1487_v8 = vpop.f32.mrf.mxu1 }
 0x811   :  { %v1394_v9 = vadd.f32 %v1390_v7, %v5127_v37  ;;  %v1488_v15 = vadd.f32 %v5237_v10, %v1487_v8 }
 0x812   :  { %v4452_v11 = vpop.f32.mrf.mxu0  ;;  %v4463_v12 = vpop.f32.mrf.mxu1 }
 0x813   :  { %v1395_v13 = vmul.f32 %v1394_v9, %v5122_v30 }
 0x815   :  { %v3986_v14 = vmul.f32 -1.442695, %v1395_v13 }
 0x817   :  { %4795 = vpow2.f32 %v3986_v14 }
 0x818   :  { %v1562_v18 = vpop.f32.mrf.mxu0 }
 0x819   :  { %v1566_v20 = vadd.f32 %v1562_v18, %v1488_v15 }
 0x81a   :  { %v4474_v23 = vpop.f32.mrf.mxu0 }
 0x81b   :  { %v1567_v24 = vmul.f32 %v1566_v20, %v5122_v30 }
 0x81d   :  { %v3989_v25 = vmul.f32 -1.442695, %v1567_v24 }
 0x81f   :  { %4797 = vpow2.f32 %v3989_v25 }
 0x820   :  { %v5308_v26 = vpop.f32.mrf.mxu0 }
 0x822   :  { %v4496_v27 = vpop.f32.mrf.mxu0 }
 0x824   :  { %v4796_v28 = vpop.eup %4795 }
 0x825   :  { %v1399_v37 = vadd.f32 1.0, %v4796_v28 }
 0x827   :  { %4799 = vrcp.f32 %v1399_v37 }
 0x82c   :  { %v4798_v29 = vpop.eup %4797 }
 0x82d   :  { %v1571_v31 = vadd.f32 1.0, %v4798_v29 }
 0x82f   :  { %4801 = vrcp.f32 %v1571_v31 }
 0x834   :  { %v4800_v32 = vpop.eup %4799 }
 0x835   :  { %v1402_v33 = vmul.f32 %v4800_v32, %v5122_v30 }
 0x837   :  { %v1403_v35 = vsub.f32 %v1402_v33, %v5138_v47 }
 0x839   :  { %1406 = vrot.lane.b32.xlu1 %v1403_v35, %s4890_s28  ;;  %v1404_v50 = vmul.f32 %v1403_v35, %v5250_v45 }
 0x83c   :  { %v4802_v36 = vpop.eup %4801 }
 0x83d   :  { %v1574_v38 = vmul.f32 %v4802_v36, %v5122_v30 }
 0x83f   :  { %v1575_v40 = vsub.f32 %v1574_v38, %v5138_v47 }
 0x841   :  { %1578 = vrot.lane.b32.xlu0 %v1575_v40, %s4890_s28  ;;  %v1576_v53 = vmul.f32 %v1575_v40, %v5253_v49  ;;  %v1595_v49 = vld [vmem:[%s5895_s3 + $0x30] sm:$0xff] }
 0x842   :  { %4478 = vmatpush3.msra.mxu1 %v1595_v49 }
 0x843   :  { %4479 = vmatprep.subr.mxu1 %v4887_v17 }
 0x844   :  { %4480 = vmatpush3.msra.mxu1 %v1594_v63 }
 0x845   :  { %4481 = vmatprep.subr.mxu1 %v4887_v17 }
 0x846   :  { %4482 = vmatpush3.msra.mxu1 %v1593_v4 }
 0x847   :  { %4497 = vmatprep.subr.mxu1 %v4887_v17 }
 0x8ab   :  { %v1407_v42 = vpop.permute.xlu1 %1406 }
 0x8ac   :  { %v1409_v44 = vmul.f32 %v1407_v42, %v1403_v35 }
 0x8ae   :  { %1411 = vrot.lane.b32.xlu1 %v1409_v44, %s4891_s29 }
 0x8b3   :  { %v1579_v46 = vpop.permute.xlu0 %1578 }
 0x8b4   :  { %v1581_v48 = vmul.f32 %v1579_v46, %v1575_v40 }
 0x8b6   :  { %1583 = vrot.lane.b32.xlu0 %v1581_v48, %s4891_s29 }
 0x920   :  { %v1412_v51 = vpop.permute.xlu1 %1411 }
 0x921   :  { %v5319_v52 = vadd.f32 %v1412_v51, %v1404_v50 }
 0x923   :  { %4803 = vtanh.f32 %v5319_v52 }
 0x928   :  { %v1584_v54 = vpop.permute.xlu0 %1583 }
 0x929   :  { %v5323_v59 = vadd.f32 %v1584_v54, %v1576_v53 }
 0x92b   :  { %4805 = vtanh.f32 %v5323_v59 }
 0x930   :  { %v4804_v61 = vpop.eup %4803 }
 0x931   :  { %1417 = vrot.lane.b32.xlu1 %v4804_v61, %s4890_s28 }
 0x938   :  { %v4806_v45 = vpop.eup %4805 }
 0x939   :  { %1589 = vrot.lane.b32.xlu0 %v4806_v45, %s4890_s28 }
 0x9a3   :  { %v1418_v5 = vpop.permute.xlu1 %1417 }
 0x9a4   :  { %v1420_v6 = vmul.f32 %v1418_v5, %v1403_v35 }
 0x9a6   :  { %1743 = vrot.lane.b32.xlu1 %v1420_v6, %s4891_s29 }
 0x9ab   :  { %v1590_v7 = vpop.permute.xlu0 %1589 }
 0x9ac   :  { %v1592_v8 = vmul.f32 %v1590_v7, %v1575_v40  ;;  %v2012_v7 = vld [vmem:[%s5895_s3 + $0x48] sm:$0xff] }
 0x9ae   :  { %1598 = vrot.lane.b32.xlu0 %v1592_v8, %s4891_s29  ;;  %v2011_v8 = vld [vmem:[%s5895_s3 + $0x40] sm:$0xff] }
 0xa18   :  { %v1744_v9 = vpop.permute.xlu1 %1743 }
 0xa19   :  { %4517 = vmatmul.mubr.msk.f32.vlgmr.msra.gmra.mxu0 %vm418_vm2, %v1744_v9 }
 0xa1a   :  { %4538 = vmatprep.mubr.msk.f32.mxu0 %vm4888_vm3, %v4887_v17 }
 0xa20   :  { %v1599_v11 = vpop.permute.xlu0 %1598 }
 0xa21   :  { %4484 = vmatmul.mubr.msk.f32.vlgmr.msra.gmra.mxu1 %vm418_vm2, %v1599_v11 }
 0xa22   :  { %4498 = vmatpush3.msra.mxu1 %v5052_v16  ;;  %4505 = vmatprep.mubr.msk.f32.mxu1 %vm4888_vm3, %v4887_v17 }
 0xa23   :  { %4499 = vmatprep.subr.mxu1 %v4887_v17 }
 0xa24   :  { %4500 = vmatpush3.msra.mxu1 %v5063_v19 }
 0xa25   :  { %4501 = vmatprep.subr.mxu1 %v4887_v17 }
 0xa26   :  { %4502 = vmatpush3.msra.mxu1 %v5073_v21 }
 0xa27   :  { %4503 = vmatprep.subr.mxu1 %v4887_v17 }
 0xa28   :  { %4504 = vmatpush3.msra.mxu1 %v5080_v22 }
 0xa29   :  { %4506 = vmatmul.mubr.msk.f32.vlgmr.msra.gmra.mxu1 %vm418_vm2, %v1744_v9  ;;  %4519 = vmatprep.subr.mxu1 %v4887_v17 }
 0xa2a   :  { %4520 = vmatpush3.msra.mxu1 %v5180_v62  ;;  %4527 = vmatprep.mubr.msk.f32.mxu1 %vm4888_vm3, %v4887_v17 }
 0xa2b   :  { %4521 = vmatprep.subr.mxu1 %v4887_v17 }
 0xa2c   :  { %4522 = vmatpush3.msra.mxu1 %v5187_v0 }
 0xa2d   :  { %4523 = vmatprep.subr.mxu1 %v4887_v17 }
 0xa2e   :  { %4524 = vmatpush3.msra.mxu1 %v5196_v1 }
 0xa2f   :  { %4525 = vmatprep.subr.mxu1 %v4887_v17 }
 0xa30   :  { %4526 = vmatpush3.msra.mxu1 %v5205_v2 }
 0xa31   :  { %4528 = vmatmul.mubr.msk.f32.vlgmr.msra.gmra.mxu1 %vm418_vm2, %v1599_v11  ;;  %4541 = vmatprep.subr.mxu1 %v4887_v17 }
 0xa32   :  { %4542 = vmatpush3.msra.mxu1 %v5052_v16  ;;  %4549 = vmatprep.mubr.msk.f32.mxu1 %vm4888_vm3, %v4887_v17 }
 0xa33   :  { %4543 = vmatprep.subr.mxu1 %v4887_v17 }
 0xa34   :  { %4544 = vmatpush3.msra.mxu1 %v5063_v19 }
 0xa35   :  { %4545 = vmatprep.subr.mxu1 %v4887_v17 }
 0xa36   :  { %4546 = vmatpush3.msra.mxu1 %v5073_v21 }
 0xa37   :  { %4547 = vmatprep.subr.mxu1 %v4887_v17 }
 0xa38   :  { %4548 = vmatpush3.msra.mxu1 %v5080_v22 }
 0xa39   :  { %4563 = vmatprep.subr.mxu1 %v4887_v17 }
 0xad9   :  { %v1910_v12 = vpop.f32.mrf.mxu0 }
 0xada   :  { %v1911_v27 = vadd.f32 %v5237_v10, %v1910_v12 }
 0xadb   :  { %v4518_v13 = vpop.f32.mrf.mxu0 }
 0xae1   :  { %v5382_v14 = vpop.f32.mrf.mxu1 }
 0xae3   :  { %v4485_v15 = vpop.f32.mrf.mxu1 }
 0xae9   :  { %v1813_v18 = vpop.f32.mrf.mxu1 }
 0xaea   :  { %v1817_v20 = vadd.f32 %v1813_v18, %v5125_v34 }
 0xaeb   :  { %v4507_v23 = vpop.f32.mrf.mxu1 }
 0xaec   :  { %v1818_v24 = vmul.f32 %v1817_v20, %v5122_v30 }
 0xaee   :  { %v3993_v25 = vmul.f32 -1.442695, %v1818_v24 }
 0xaf0   :  { %4807 = vpow2.f32 %v3993_v25 }
 0xaf1   :  { %v1980_v28 = vpop.f32.mrf.mxu1 }
 0xaf2   :  { %v1984_v37 = vadd.f32 %v1980_v28, %v1911_v27 }
 0xaf3   :  { %v4529_v29 = vpop.f32.mrf.mxu1 }
 0xaf4   :  { %v1985_v31 = vmul.f32 %v1984_v37, %v5122_v30 }
 0xaf6   :  { %v3996_v32 = vmul.f32 -1.442695, %v1985_v31 }
 0xaf8   :  { %4809 = vpow2.f32 %v3996_v32 }
 0xafd   :  { %v4808_v33 = vpop.eup %4807 }
 0xafe   :  { %v1822_v35 = vadd.f32 1.0, %v4808_v33 }
 0xb00   :  { %4811 = vrcp.f32 %v1822_v35 }
 0xb05   :  { %v4810_v36 = vpop.eup %4809 }
 0xb06   :  { %v1989_v38 = vadd.f32 1.0, %v4810_v36 }
 0xb08   :  { %4813 = vrcp.f32 %v1989_v38 }
 0xb0d   :  { %v4812_v34 = vpop.eup %4811 }
 0xb0e   :  { %v1825_v40 = vmul.f32 %v4812_v34, %v5122_v30 }
 0xb10   :  { %v1826_v42 = vsub.f32 %v1825_v40, %v5138_v47 }
 0xb12   :  { %1829 = vrot.lane.b32.xlu1 %v1826_v42, %s4890_s28  ;;  %v1827_v60 = vmul.f32 %v1826_v42, %v5319_v52  ;;  %v2014_v52 = vld [vmem:[%s5895_s3 + $0x58] sm:$0xff] }
 0xb13   :  { %4531 = vmatpush3.msra.mxu0 %v2014_v52 }
 0xb14   :  { %4532 = vmatprep.subr.mxu0 %v4887_v17 }
 0xb15   :  { %v4814_v44 = vpop.eup %4813 }
 0xb16   :  { %v1992_v46 = vmul.f32 %v4814_v44, %v5122_v30 }
 0xb18   :  { %v1993_v48 = vsub.f32 %v1992_v46, %v5138_v47 }
 0xb1a   :  { %1996 = vrot.lane.b32.xlu0 %v1993_v48, %s4890_s28  ;;  %v1994_v49 = vmul.f32 %v1993_v48, %v5323_v59  ;;  %v2013_v59 = vld [vmem:[%s5895_s3 + $0x50] sm:$0xff] }
 0xb1b   :  { %4533 = vmatpush3.msra.mxu0 %v2013_v59 }
 0xb1c   :  { %4534 = vmatprep.subr.mxu0 %v4887_v17 }
 0xb1d   :  { %4535 = vmatpush3.msra.mxu0 %v2012_v7  ;;  %v2362_v7 = vld [vmem:[%s5895_s3 + $0x70] sm:$0xff] }
 0xb1e   :  { %4536 = vmatprep.subr.mxu0 %v4887_v17 }
 0xb1f   :  { %4537 = vmatpush3.msra.mxu0 %v2011_v8  ;;  %v2360_v8 = vld [vmem:[%s5895_s3 + $0x60] sm:$0xff] }
 0xb20   :  { %4552 = vmatprep.subr.mxu0 %v4887_v17 }
 0xb84   :  { %v1830_v50 = vpop.permute.xlu1 %1829 }
 0xb85   :  { %v1832_v51 = vmul.f32 %v1830_v50, %v1826_v42 }
 0xb87   :  { %1834 = vrot.lane.b32.xlu1 %v1832_v51, %s4891_s29 }
 0xb8c   :  { %v1997_v53 = vpop.permute.xlu0 %1996 }
 0xb8d   :  { %v1999_v54 = vmul.f32 %v1997_v53, %v1993_v48 }
 0xb8f   :  { %2001 = vrot.lane.b32.xlu0 %v1999_v54, %s4891_s29 }
 0xbf9   :  { %v1835_v61 = vpop.permute.xlu1 %1834 }
 0xbfa   :  { %v5397_v45 = vadd.f32 %v1835_v61, %v1827_v60 }
 0xbfc   :  { %4815 = vtanh.f32 %v5397_v45 }
 0xc01   :  { %v2002_v63 = vpop.permute.xlu0 %2001 }
 0xc02   :  { %v5401_v4 = vadd.f32 %v2002_v63, %v1994_v49 }
 0xc04   :  { %4817 = vtanh.f32 %v5401_v4 }
 0xc09   :  { %v4816_v5 = vpop.eup %4815 }
 0xc0a   :  { %1840 = vrot.lane.b32.xlu1 %v4816_v5, %s4890_s28 }
 0xc11   :  { %v4818_v6 = vpop.eup %4817 }
 0xc12   :  { %2007 = vrot.lane.b32.xlu0 %v4818_v6, %s4890_s28 }
 0xc7c   :  { %v1841_v9 = vpop.permute.xlu1 %1840 }
 0xc7d   :  { %v1843_v11 = vmul.f32 %v1841_v9, %v1826_v42 }
 0xc7f   :  { %2092 = vrot.lane.b32.xlu1 %v1843_v11, %s4891_s29 }
 0xc84   :  { %v2008_v12 = vpop.permute.xlu0 %2007 }
 0xc85   :  { %v2010_v13 = vmul.f32 %v2008_v12, %v1993_v48 }
 0xc87   :  { %2016 = vrot.lane.b32.xlu0 %v2010_v13, %s4891_s29 }
 0xcf1   :  { %v2093_v15 = vpop.permute.xlu1 %2092 }
 0xcf2   :  { %4550 = vmatmul.mubr.msk.f32.vlgmr.msra.gmra.mxu1 %vm418_vm2, %v2093_v15 }
 0xcf3   :  { %4564 = vmatpush3.msra.mxu1 %v5180_v62  ;;  %4571 = vmatprep.mubr.msk.f32.mxu1 %vm4888_vm3, %v4887_v17 }
 0xcf4   :  { %4565 = vmatprep.subr.mxu1 %v4887_v17 }
 0xcf5   :  { %4566 = vmatpush3.msra.mxu1 %v5187_v0 }
 0xcf6   :  { %4567 = vmatprep.subr.mxu1 %v4887_v17 }
 0xcf7   :  { %4568 = vmatpush3.msra.mxu1 %v5196_v1 }
 0xcf8   :  { %4569 = vmatprep.subr.mxu1 %v4887_v17 }
 0xcf9   :  { %4570 = vmatpush3.msra.mxu1 %v5205_v2  ;;  %v2017_v18 = vpop.permute.xlu0 %2016 }
 0xcfa   :  { %4539 = vmatmul.mubr.msk.f32.vlgmr.msra.gmra.mxu0 %vm418_vm2, %v2017_v18  ;;  %4572 = vmatmul.mubr.msk.f32.vlgmr.msra.gmra.mxu1 %vm418_vm2, %v2017_v18 }
 0xcfb   :  { %4553 = vmatpush3.msra.mxu0 %v5150_v55  ;;  %4560 = vmatprep.mubr.msk.f32.mxu0 %vm4888_vm3, %v4887_v17 }
 0xcfc   :  { %4554 = vmatprep.subr.mxu0 %v4887_v17  ;;  %4585 = vmatprep.subr.mxu1 %v4887_v17 }
 0xcfd   :  { %4555 = vmatpush3.msra.mxu0 %v5155_v56  ;;  %4586 = vmatpush3.msra.mxu1 %v5052_v16 }
 0xcfe   :  { %4556 = vmatprep.subr.mxu0 %v4887_v17  ;;  %4587 = vmatprep.subr.mxu1 %v4887_v17 }
 0xcff   :  { %4557 = vmatpush3.msra.mxu0 %v5162_v57  ;;  %4588 = vmatpush3.msra.mxu1 %v5063_v19 }
 0xd00   :  { %4558 = vmatprep.subr.mxu0 %v4887_v17  ;;  %4589 = vmatprep.subr.mxu1 %v4887_v17 }
 0xd01   :  { %4559 = vmatpush3.msra.mxu0 %v5169_v58  ;;  %4590 = vmatpush3.msra.mxu1 %v5073_v21 }
 0xd02   :  { %4561 = vmatmul.mubr.msk.f32.vlgmr.msra.gmra.mxu0 %vm418_vm2, %v2093_v15  ;;  %4591 = vmatprep.subr.mxu1 %v4887_v17 }
 0xd03   :  { %4592 = vmatpush3.msra.mxu1 %v5080_v22  ;;  %4593 = vmatprep.mubr.msk.f32.mxu1 %vm4888_vm3, %v4887_v17  ;;  %v1739_v22 = vadd.f32 %v5308_v26, %v5382_v14 }
 0xd04   :  { %4574 = vmatprep.subr.mxu0 %v4887_v17  ;;  %4607 = vmatprep.subr.mxu1 %v4887_v17 }
 0xd05   :  { %4582 = vmatprep.mubr.msk.f32.mxu0 %vm4888_vm3, %v4887_v17 }
 0xdb2   :  { %v2162_v16 = vpop.f32.mrf.mxu1 }
 0xdb3   :  { %v2166_v19 = vadd.f32 %v2162_v16, %v5131_v41  ;;  %v5524_v16 = vld [vmem:[%s5894_s2 + $0x38] sm:$0xff] }
 0xdb4   :  { %v4551_v21 = vpop.f32.mrf.mxu1 }
 0xdb5   :  { %v2167_v20 = vmul.f32 %v2166_v19, %v5122_v30 }
 0xdb7   :  { %v3999_v23 = vmul.f32 -1.442695, %v2167_v20 }
 0xdb9   :  { %4819 = vpow2.f32 %v3999_v23 }
 0xdba   :  { %v2086_v24 = vpop.f32.mrf.mxu0  ;;  %v2329_v25 = vpop.f32.mrf.mxu1 }
 0xdbb   :  { %v5464_v27 = vadd.f32 %v2086_v24, %v1739_v22 }
 0xdbc   :  { %v4540_v28 = vpop.f32.mrf.mxu0  ;;  %v4573_v37 = vpop.f32.mrf.mxu1 }
 0xdc2   :  { %v2259_v29 = vpop.f32.mrf.mxu0 }
 0xdc3   :  { %v2260_v31 = vadd.f32 %v5237_v10, %v2259_v29 }
 0xdc4   :  { %v4562_v32 = vpop.f32.mrf.mxu0 }
 0xdc5   :  { %v2333_v33 = vadd.f32 %v2329_v25, %v2260_v31 }
 0xdc6   :  { %v4820_v41 = vpop.eup %4819 }
 0xdc7   :  { %v2171_v35 = vadd.f32 1.0, %v4820_v41  ;;  %v2334_v36 = vmul.f32 %v2333_v33, %v5122_v30 }
 0xdc9   :  { %4821 = vrcp.f32 %v2171_v35  ;;  %v4002_v38 = vmul.f32 -1.442695, %v2334_v36 }
 0xdcb   :  { %4823 = vpow2.f32 %v4002_v38 }
 0xdd6   :  { %v4822_v26 = vpop.eup %4821 }
 0xdd7   :  { %v2174_v14 = vmul.f32 %v4822_v26, %v5122_v30 }
 0xdd8   :  { %v4824_v34 = vpop.eup %4823 }
 0xdd9   :  { %v2338_v40 = vadd.f32 1.0, %v4824_v34  ;;  %v2175_v42 = vsub.f32 %v2174_v14, %v5138_v47 }
 0xddb   :  { %4825 = vrcp.f32 %v2338_v40  ;;  %2178 = vrot.lane.b32.xlu1 %v2175_v42, %s4890_s28  ;;  %v2176_v60 = vmul.f32 %v2175_v42, %v5397_v45  ;;  %v2363_v45 = vld [vmem:[%s5895_s3 + $0x78] sm:$0xff] }
 0xddc   :  { %4575 = vmatpush3.msra.mxu0 %v2363_v45  ;;  %v2711_v45 = vld [vmem:[%s5895_s3 + $0x90] sm:$0xff] }
 0xddd   :  { %4576 = vmatprep.subr.mxu0 %v4887_v17 }
 0xdde   :  { %4577 = vmatpush3.msra.mxu0 %v2362_v7  ;;  %v2709_v7 = vld [vmem:[%s5895_s3 + $0x80] sm:$0xff] }
 0xddf   :  { %4578 = vmatprep.subr.mxu0 %v4887_v17 }
 0xde8   :  { %v4826_v44 = vpop.eup %4825 }
 0xde9   :  { %v2341_v46 = vmul.f32 %v4826_v44, %v5122_v30 }
 0xdeb   :  { %v2342_v48 = vsub.f32 %v2341_v46, %v5138_v47 }
 0xded   :  { %2345 = vrot.lane.b32.xlu0 %v2342_v48, %s4890_s28  ;;  %v2343_v5 = vmul.f32 %v2342_v48, %v5401_v4  ;;  %v2361_v4 = vld [vmem:[%s5895_s3 + $0x68] sm:$0xff] }
 0xdee   :  { %4579 = vmatpush3.msra.mxu0 %v2361_v4 }
 0xdef   :  { %4580 = vmatprep.subr.mxu0 %v4887_v17 }
 0xdf0   :  { %4581 = vmatpush3.msra.mxu0 %v2360_v8 }
 0xdf1   :  { %4596 = vmatprep.subr.mxu0 %v4887_v17 }
 0xe4d   :  { %v2179_v50 = vpop.permute.xlu1 %2178 }
 0xe4e   :  { %v2181_v51 = vmul.f32 %v2179_v50, %v2175_v42 }
 0xe50   :  { %2183 = vrot.lane.b32.xlu1 %v2181_v51, %s4891_s29 }
 0xe5f   :  { %v2346_v53 = vpop.permute.xlu0 %2345 }
 0xe60   :  { %v2348_v54 = vmul.f32 %v2346_v53, %v2342_v48 }
 0xe62   :  { %2350 = vrot.lane.b32.xlu0 %v2348_v54, %s4891_s29 }
 0xec2   :  { %v2184_v61 = vpop.permute.xlu1 %2183 }
 0xec3   :  { %v5477_v49 = vadd.f32 %v2184_v61, %v2176_v60 }
 0xec5   :  { %4827 = vtanh.f32 %v5477_v49 }
 0xed2   :  { %v4828_v63 = vpop.eup %4827 }
 0xed3   :  { %2189 = vrot.lane.b32.xlu1 %v4828_v63, %s4890_s28 }
 0xed4   :  { %v2351_v6 = vpop.permute.xlu0 %2350 }
 0xed5   :  { %v5482_v52 = vadd.f32 %v2351_v6, %v2343_v5 }
 0xed7   :  { %4829 = vtanh.f32 %v5482_v52 }
 0xee4   :  { %v4830_v59 = vpop.eup %4829 }
 0xee5   :  { %2356 = vrot.lane.b32.xlu0 %v4830_v59, %s4890_s28 }
 0xf45   :  { %v2190_v9 = vpop.permute.xlu1 %2189 }
 0xf46   :  { %v2192_v11 = vmul.f32 %v2190_v9, %v2175_v42 }
 0xf48   :  { %2441 = vrot.lane.b32.xlu1 %v2192_v11, %s4891_s29 }
 0xf57   :  { %v2357_v12 = vpop.permute.xlu0 %2356 }
 0xf58   :  { %v2359_v13 = vmul.f32 %v2357_v12, %v2342_v48 }
 0xf5a   :  { %2365 = vrot.lane.b32.xlu0 %v2359_v13, %s4891_s29 }
 0xfba   :  { %v2442_v15 = vpop.permute.xlu1 %2441 }
 0xfbb   :  { %4594 = vmatmul.mubr.msk.f32.vlgmr.msra.gmra.mxu1 %vm418_vm2, %v2442_v15 }
 0xfbc   :  { %4608 = vmatpush3.msra.mxu1 %v5180_v62  ;;  %4615 = vmatprep.mubr.msk.f32.mxu1 %vm4888_vm3, %v4887_v17 }
 0xfbd   :  { %4609 = vmatprep.subr.mxu1 %v4887_v17 }
 0xfbe   :  { %4610 = vmatpush3.msra.mxu1 %v5187_v0 }
 0xfbf   :  { %4611 = vmatprep.subr.mxu1 %v4887_v17 }
 0xfc0   :  { %4612 = vmatpush3.msra.mxu1 %v5196_v1 }
 0xfc1   :  { %4613 = vmatprep.subr.mxu1 %v4887_v17 }
 0xfc2   :  { %4614 = vmatpush3.msra.mxu1 %v5205_v2 }
 0xfc3   :  { %4629 = vmatprep.subr.mxu1 %v4887_v17 }
 0xfcc   :  { %v2366_v18 = vpop.permute.xlu0 %2365 }
 0xfcd   :  { %4583 = vmatmul.mubr.msk.f32.vlgmr.msra.gmra.mxu0 %vm418_vm2, %v2366_v18  ;;  %4616 = vmatmul.mubr.msk.f32.vlgmr.msra.gmra.mxu1 %vm418_vm2, %v2366_v18 }
 0xfce   :  { %4597 = vmatpush3.msra.mxu0 %v5150_v55  ;;  %4604 = vmatprep.mubr.msk.f32.mxu0 %vm4888_vm3, %v4887_v17  ;;  %v5533_v55 = vld [vmem:[%s5894_s2 + $0x30] sm:$0xff] }
 0xfcf   :  { %4598 = vmatprep.subr.mxu0 %v4887_v17  ;;  %4630 = vmatpush3.msra.mxu1 %v5524_v16 }
 0xfd0   :  { %4599 = vmatpush3.msra.mxu0 %v5155_v56  ;;  %4631 = vmatprep.subr.mxu1 %v4887_v17  ;;  %v5542_v56 = vld [vmem:[%s5894_s2 + $0x28] sm:$0xff] }
 0xfd1   :  { %4600 = vmatprep.subr.mxu0 %v4887_v17  ;;  %4632 = vmatpush3.msra.mxu1 %v5533_v55 }
 0xfd2   :  { %4601 = vmatpush3.msra.mxu0 %v5162_v57  ;;  %4633 = vmatprep.subr.mxu1 %v4887_v17  ;;  %v5551_v57 = vld [vmem:[%s5894_s2 + $0x20] sm:$0xff] }
 0xfd3   :  { %4602 = vmatprep.subr.mxu0 %v4887_v17  ;;  %4634 = vmatpush3.msra.mxu1 %v5542_v56 }
 0xfd4   :  { %4603 = vmatpush3.msra.mxu0 %v5169_v58  ;;  %4635 = vmatprep.subr.mxu1 %v4887_v17 }
 0xfd5   :  { %4605 = vmatmul.mubr.msk.f32.vlgmr.msra.gmra.mxu0 %vm418_vm2, %v2442_v15  ;;  %4636 = vmatpush3.msra.mxu1 %v5551_v57  ;;  %v4881_v15 = vld [vmem:[%s5894_s2 + $0x40] ss:$0 sm:$0xff] }
 0xfd6   :  { %4637 = vmatprep.mubr.msk.f32.mxu1 %vm4888_vm3, %v4887_v17  ;;  %4618 = vmatprep.subr.mxu0 %v4887_v17  ;;  %v938_v18 = vadd.f32 %v4881_v15, %v5230_v3 }
 0xfd7   :  { %4651 = vmatprep.subr.mxu1 %v4887_v17  ;;  %4626 = vmatprep.mubr.msk.f32.mxu0 %vm4888_vm3, %v4887_v17 }
0x107b   :  { %v2511_v58 = vpop.f32.mrf.mxu1 }
0x107c   :  { %v2515_v19 = vadd.f32 %v2511_v58, %v5129_v39 }
0x107d   :  { %v4595_v21 = vpop.f32.mrf.mxu1 }
0x107e   :  { %v2516_v20 = vmul.f32 %v2515_v19, %v5122_v30 }
0x1080   :  { %v4005_v23 = vmul.f32 -1.442695, %v2516_v20 }
0x1082   :  { %4831 = vpow2.f32 %v4005_v23 }
0x108d   :  { %v2435_v22 = vpop.f32.mrf.mxu0  ;;  %v2678_v24 = vpop.f32.mrf.mxu1 }
0x108e   :  { %v5563_v25 = vadd.f32 %v2435_v22, %v5464_v27 }
0x108f   :  { %v4832_v28 = vpop.eup %4831  ;;  %v4584_v37 = vpop.f32.mrf.mxu0 }
0x1090   :  { %v4617_v29 = vpop.f32.mrf.mxu1  ;;  %v2520_v31 = vadd.f32 1.0, %v4832_v28 }
0x1092   :  { %4833 = vrcp.f32 %v2520_v31 }
0x1095   :  { %v2608_v32 = vpop.f32.mrf.mxu0 }
0x1096   :  { %v2609_v33 = vadd.f32 %v5237_v10, %v2608_v32 }
0x1097   :  { %v4606_v41 = vpop.f32.mrf.mxu0 }
0x1098   :  { %v2682_v39 = vadd.f32 %v2678_v24, %v2609_v33 }
0x109a   :  { %v2683_v35 = vmul.f32 %v2682_v39, %v5122_v30 }
0x109c   :  { %v4008_v36 = vmul.f32 -1.442695, %v2683_v35 }
0x109e   :  { %4835 = vpow2.f32 %v4008_v36 }
0x109f   :  { %v4834_v38 = vpop.eup %4833 }
0x10a0   :  { %v2523_v26 = vmul.f32 %v4834_v38, %v5122_v30 }
0x10a2   :  { %v2524_v27 = vsub.f32 %v2523_v26, %v5138_v47 }
0x10a4   :  { %2527 = vrot.lane.b32.xlu1 %v2524_v27, %s4890_s28  ;;  %v2525_v53 = vmul.f32 %v2524_v27, %v5477_v49  ;;  %v2712_v49 = vld [vmem:[%s5895_s3 + $0x98] sm:$0xff] }
0x10a5   :  { %4619 = vmatpush3.msra.mxu0 %v2712_v49 }
0x10a6   :  { %4620 = vmatprep.subr.mxu0 %v4887_v17 }
0x10a7   :  { %4621 = vmatpush3.msra.mxu0 %v2711_v45 }
0x10a8   :  { %4622 = vmatprep.subr.mxu0 %v4887_v17 }
0x10ab   :  { %v4836_v14 = vpop.eup %4835 }
0x10ac   :  { %v2687_v34 = vadd.f32 1.0, %v4836_v14 }
0x10ae   :  { %4837 = vrcp.f32 %v2687_v34 }
0x10bb   :  { %v4838_v40 = vpop.eup %4837 }
0x10bc   :  { %v2690_v42 = vmul.f32 %v4838_v40, %v5122_v30 }
0x10be   :  { %v2691_v44 = vsub.f32 %v2690_v42, %v5138_v47 }
0x10c0   :  { %2694 = vrot.lane.b32.xlu0 %v2691_v44, %s4890_s28  ;;  %v2692_v63 = vmul.f32 %v2691_v44, %v5482_v52  ;;  %v2710_v52 = vld [vmem:[%s5895_s3 + $0x88] sm:$0xff] }
0x10c1   :  { %4623 = vmatpush3.msra.mxu0 %v2710_v52 }
0x10c2   :  { %4624 = vmatprep.subr.mxu0 %v4887_v17 }
0x10c3   :  { %4625 = vmatpush3.msra.mxu0 %v2709_v7  ;;  %v5709_v7 = vld [vmem:[%s5894_s2 + $0x80] sm:$0xff] }
0x10c4   :  { %4640 = vmatprep.subr.mxu0 %v4887_v17 }
0x1116   :  { %v2528_v46 = vpop.permute.xlu1 %2527 }
0x1117   :  { %v2530_v48 = vmul.f32 %v2528_v46, %v2524_v27 }
0x1119   :  { %2532 = vrot.lane.b32.xlu1 %v2530_v48, %s4891_s29 }
0x1132   :  { %v2695_v50 = vpop.permute.xlu0 %2694 }
0x1133   :  { %v2697_v51 = vmul.f32 %v2695_v50, %v2691_v44 }
0x1135   :  { %2699 = vrot.lane.b32.xlu0 %v2697_v51, %s4891_s29 }
0x118b   :  { %v2533_v54 = vpop.permute.xlu1 %2532 }
0x118c   :  { %v5576_v60 = vadd.f32 %v2533_v54, %v2525_v53 }
0x118e   :  { %4839 = vtanh.f32 %v5576_v60 }
0x119b   :  { %v4840_v61 = vpop.eup %4839 }
0x119c   :  { %2538 = vrot.lane.b32.xlu1 %v4840_v61, %s4890_s28  ;;  %v3060_v61 = vld [vmem:[%s5895_s3 + $0xb0] sm:$0xff] }
0x11a7   :  { %v2700_v5 = vpop.permute.xlu0 %2699 }
0x11a8   :  { %v5581_v6 = vadd.f32 %v2700_v5, %v2692_v63  ;;  %v3059_v63 = vld [vmem:[%s5895_s3 + $0xa8] sm:$0xff]  ;;  %v3058_v5 = vld [vmem:[%s5895_s3 + $0xa0] sm:$0xff] }
0x11aa   :  { %4841 = vtanh.f32 %v5581_v6 }
0x11b7   :  { %v4842_v59 = vpop.eup %4841 }
0x11b8   :  { %2705 = vrot.lane.b32.xlu0 %v4842_v59, %s4890_s28 }
0x120e   :  { %v2539_v4 = vpop.permute.xlu1 %2538 }
0x120f   :  { %v2541_v8 = vmul.f32 %v2539_v4, %v2524_v27  ;;  %v5718_v4 = vld [vmem:[%s5894_s2 + $0x78] sm:$0xff] }
0x1211   :  { %2790 = vrot.lane.b32.xlu1 %v2541_v8, %s4891_s29  ;;  %v5725_v8 = vld [vmem:[%s5894_s2 + $0x70] sm:$0xff] }
0x122a   :  { %v2706_v9 = vpop.permute.xlu0 %2705 }
0x122b   :  { %v2708_v11 = vmul.f32 %v2706_v9, %v2691_v44  ;;  %v5732_v9 = vld [vmem:[%s5894_s2 + $0x68] sm:$0xff] }
0x122d   :  { %2714 = vrot.lane.b32.xlu0 %v2708_v11, %s4891_s29 }
0x1283   :  { %v2791_v12 = vpop.permute.xlu1 %2790 }
0x1284   :  { %4638 = vmatmul.mubr.msk.f32.vlgmr.msra.gmra.mxu1 %vm418_vm2, %v2791_v12 }
0x1285   :  { %4652 = vmatpush3.msra.mxu1 %v5180_v62  ;;  %4659 = vmatprep.mubr.msk.f32.mxu1 %vm4888_vm3, %v4887_v17  ;;  %v5619_v62 = vld [vmem:[%s5894_s2 + $0x60] sm:$0xff] }
0x1286   :  { %4653 = vmatprep.subr.mxu1 %v4887_v17 }
0x1287   :  { %4654 = vmatpush3.msra.mxu1 %v5187_v0  ;;  %v5629_v0 = vld [vmem:[%s5894_s2 + $0x58] sm:$0xff] }
0x1288   :  { %4655 = vmatprep.subr.mxu1 %v4887_v17 }
0x1289   :  { %4656 = vmatpush3.msra.mxu1 %v5196_v1  ;;  %v5638_v1 = vld [vmem:[%s5894_s2 + $0x50] sm:$0xff] }
0x128a   :  { %4657 = vmatprep.subr.mxu1 %v4887_v17 }
0x128b   :  { %4658 = vmatpush3.msra.mxu1 %v5205_v2  ;;  %v5647_v2 = vld [vmem:[%s5894_s2 + $0x48] sm:$0xff] }
0x128c   :  { %4673 = vmatprep.subr.mxu1 %v4887_v17 }
0x129f   :  { %v2715_v13 = vpop.permute.xlu0 %2714 }
0x12a0   :  { %4627 = vmatmul.mubr.msk.f32.vlgmr.msra.gmra.mxu0 %vm418_vm2, %v2715_v13  ;;  %4660 = vmatmul.mubr.msk.f32.vlgmr.msra.gmra.mxu1 %vm418_vm2, %v2715_v13 }
0x12a1   :  { %4641 = vmatpush3.msra.mxu0 %v5619_v62  ;;  %4648 = vmatprep.mubr.msk.f32.mxu0 %vm4888_vm3, %v4887_v17 }
0x12a2   :  { %4642 = vmatprep.subr.mxu0 %v4887_v17  ;;  %4674 = vmatpush3.msra.mxu1 %v5524_v16 }
0x12a3   :  { %4643 = vmatpush3.msra.mxu0 %v5629_v0  ;;  %4675 = vmatprep.subr.mxu1 %v4887_v17 }
0x12a4   :  { %4644 = vmatprep.subr.mxu0 %v4887_v17  ;;  %4676 = vmatpush3.msra.mxu1 %v5533_v55 }
0x12a5   :  { %4645 = vmatpush3.msra.mxu0 %v5638_v1  ;;  %4677 = vmatprep.subr.mxu1 %v4887_v17 }
0x12a6   :  { %4646 = vmatprep.subr.mxu0 %v4887_v17  ;;  %4678 = vmatpush3.msra.mxu1 %v5542_v56 }
0x12a7   :  { %4647 = vmatpush3.msra.mxu0 %v5647_v2  ;;  %4679 = vmatprep.subr.mxu1 %v4887_v17 }
0x12a8   :  { %4649 = vmatmul.mubr.msk.f32.vlgmr.msra.gmra.mxu0 %vm418_vm2, %v2791_v12  ;;  %4680 = vmatpush3.msra.mxu1 %v5551_v57 }
0x12a9   :  { %4681 = vmatprep.mubr.msk.f32.mxu1 %vm4888_vm3, %v4887_v17  ;;  %4662 = vmatprep.subr.mxu0 %v4887_v17 }
0x12aa   :  { %4695 = vmatprep.subr.mxu1 %v4887_v17  ;;  %4670 = vmatprep.mubr.msk.f32.mxu0 %vm4888_vm3, %v4887_v17 }
0x1344   :  { %v2860_v16 = vpop.f32.mrf.mxu1 }
0x1345   :  { %v2864_v55 = vadd.f32 %v2860_v16, %v938_v18 }
0x1346   :  { %v4639_v56 = vpop.f32.mrf.mxu1 }
0x1347   :  { %v2865_v57 = vmul.f32 %v2864_v55, %v5122_v30 }
0x1349   :  { %v4011_v58 = vmul.f32 -1.442695, %v2865_v57 }
0x134b   :  { %4843 = vpow2.f32 %v4011_v58 }
0x1358   :  { %v4844_v19 = vpop.eup %4843 }
0x1359   :  { %v2869_v21 = vadd.f32 1.0, %v4844_v19 }
0x135b   :  { %4845 = vrcp.f32 %v2869_v21 }
0x1360   :  { %v2784_v20 = vpop.f32.mrf.mxu0  ;;  %v3027_v23 = vpop.f32.mrf.mxu1 }
0x1361   :  { %v5665_v22 = vadd.f32 %v2784_v20, %v5563_v25  ;;  %v5772_v20 = vld [vmem:[%s5894_s2 + $0x88] ss:$0 sm:$0xff] }
0x1362   :  { %v4628_v24 = vpop.f32.mrf.mxu0  ;;  %v4661_v28 = vpop.f32.mrf.mxu1 }
0x1368   :  { %v4846_v37 = vpop.eup %4845  ;;  %v2957_v29 = vpop.f32.mrf.mxu0 }
0x1369   :  { %v2958_v3 = vadd.f32 %v5237_v10, %v2957_v29  ;;  %v2872_v31 = vmul.f32 %v4846_v37, %v5122_v30 }
0x136a   :  { %v4650_v32 = vpop.f32.mrf.mxu0 }
0x136b   :  { %v3031_v33 = vadd.f32 %v3027_v23, %v2958_v3  ;;  %v2873_v41 = vsub.f32 %v2872_v31, %v5138_v47 }
0x136d   :  { %v3032_v39 = vmul.f32 %v3031_v33, %v5122_v30  ;;  %2876 = vrot.lane.b32.xlu1 %v2873_v41, %s4890_s28  ;;  %v2874_v42 = vmul.f32 %v2873_v41, %v5576_v60  ;;  %v3061_v60 = vld [vmem:[%s5895_s3 + $0xb8] sm:$0xff] }
0x136e   :  { %4663 = vmatpush3.msra.mxu0 %v3061_v60 }
0x136f   :  { %v4014_v35 = vmul.f32 -1.442695, %v3032_v39  ;;  %4664 = vmatprep.subr.mxu0 %v4887_v17 }
0x1370   :  { %4665 = vmatpush3.msra.mxu0 %v3060_v61 }
0x1371   :  { %4847 = vpow2.f32 %v4014_v35  ;;  %4666 = vmatprep.subr.mxu0 %v4887_v17 }
0x1372   :  { %4667 = vmatpush3.msra.mxu0 %v3059_v63 }
0x1373   :  { %4668 = vmatprep.subr.mxu0 %v4887_v17 }
0x1374   :  { %4669 = vmatpush3.msra.mxu0 %v3058_v5 }
0x1375   :  { %4684 = vmatprep.subr.mxu0 %v4887_v17 }
0x137e   :  { %v4848_v25 = vpop.eup %4847 }
0x137f   :  { %v3036_v36 = vadd.f32 1.0, %v4848_v25 }
0x1381   :  { %4849 = vrcp.f32 %v3036_v36 }
0x138e   :  { %v4850_v38 = vpop.eup %4849 }
0x138f   :  { %v3039_v26 = vmul.f32 %v4850_v38, %v5122_v30 }
0x1391   :  { %v3040_v10 = vsub.f32 %v3039_v26, %v5138_v47 }
0x1393   :  { %3043 = vrot.lane.b32.xlu0 %v3040_v10, %s4890_s28  ;;  %v3041_v50 = vmul.f32 %v3040_v10, %v5581_v6 }
0x13df   :  { %v2877_v27 = vpop.permute.xlu1 %2876 }
0x13e0   :  { %v2879_v14 = vmul.f32 %v2877_v27, %v2873_v41 }
0x13e2   :  { %2881 = vrot.lane.b32.xlu1 %v2879_v14, %s4891_s29 }
0x1405   :  { %v3044_v34 = vpop.permute.xlu0 %3043 }
0x1406   :  { %v3046_v40 = vmul.f32 %v3044_v34, %v3040_v10 }
0x1408   :  { %3048 = vrot.lane.b32.xlu0 %v3046_v40, %s4891_s29 }
0x1454   :  { %v2882_v44 = vpop.permute.xlu1 %2881 }
0x1455   :  { %v5678_v46 = vadd.f32 %v2882_v44, %v2874_v42  ;;  %v3410_v42 = vld [vmem:[%s5895_s3 + $0xd8] sm:$0xff]  ;;  %v3409_v44 = vld [vmem:[%s5895_s3 + $0xd0] sm:$0xff] }
0x1457   :  { %4851 = vtanh.f32 %v5678_v46 }
0x1464   :  { %v4852_v48 = vpop.eup %4851 }
0x1465   :  { %2887 = vrot.lane.b32.xlu1 %v4852_v48, %s4890_s28  ;;  %v3407_v48 = vld [vmem:[%s5895_s3 + $0xc0] sm:$0xff] }
0x147a   :  { %v3049_v51 = vpop.permute.xlu0 %3048 }
0x147b   :  { %v5683_v53 = vadd.f32 %v3049_v51, %v3041_v50 }
0x147d   :  { %4853 = vtanh.f32 %v5683_v53 }
0x148a   :  { %v4854_v54 = vpop.eup %4853 }
0x148b   :  { %3054 = vrot.lane.b32.xlu0 %v4854_v54, %s4890_s28 }
0x14d7   :  { %v2888_v6 = vpop.permute.xlu1 %2887 }
0x14d8   :  { %v2890_v59 = vmul.f32 %v2888_v6, %v2873_v41 }
0x14da   :  { %3139 = vrot.lane.b32.xlu1 %v2890_v59, %s4891_s29 }
0x14fd   :  { %v3055_v49 = vpop.permute.xlu0 %3054 }
0x14fe   :  { %v3057_v45 = vmul.f32 %v3055_v49, %v3040_v10 }
0x1500   :  { %3063 = vrot.lane.b32.xlu0 %v3057_v45, %s4891_s29 }
0x154c   :  { %v3140_v52 = vpop.permute.xlu1 %3139 }
0x154d   :  { %4682 = vmatmul.mubr.msk.f32.vlgmr.msra.gmra.mxu1 %vm418_vm2, %v3140_v52 }
0x154e   :  { %4696 = vmatpush3.msra.mxu1 %v5709_v7  ;;  %4703 = vmatprep.mubr.msk.f32.mxu1 %vm4888_vm3, %v4887_v17 }
0x154f   :  { %4697 = vmatprep.subr.mxu1 %v4887_v17 }
0x1550   :  { %4698 = vmatpush3.msra.mxu1 %v5718_v4 }
0x1551   :  { %4699 = vmatprep.subr.mxu1 %v4887_v17 }
0x1552   :  { %4700 = vmatpush3.msra.mxu1 %v5725_v8 }
0x1553   :  { %4701 = vmatprep.subr.mxu1 %v4887_v17 }
0x1554   :  { %4702 = vmatpush3.msra.mxu1 %v5732_v9 }
0x1555   :  { %4717 = vmatprep.subr.mxu1 %v4887_v17 }
0x1572   :  { %v3064_v11 = vpop.permute.xlu0 %3063 }
0x1573   :  { %4671 = vmatmul.mubr.msk.f32.vlgmr.msra.gmra.mxu0 %vm418_vm2, %v3064_v11  ;;  %4704 = vmatmul.mubr.msk.f32.vlgmr.msra.gmra.mxu1 %vm418_vm2, %v3064_v11 }
0x1574   :  { %4685 = vmatpush3.msra.mxu0 %v5619_v62  ;;  %4692 = vmatprep.mubr.msk.f32.mxu0 %vm4888_vm3, %v4887_v17 }
0x1575   :  { %4686 = vmatprep.subr.mxu0 %v4887_v17  ;;  %4718 = vmatpush3.msra.mxu1 %v5619_v62 }
0x1576   :  { %4687 = vmatpush3.msra.mxu0 %v5629_v0  ;;  %4719 = vmatprep.subr.mxu1 %v4887_v17 }
0x1577   :  { %4688 = vmatprep.subr.mxu0 %v4887_v17  ;;  %4720 = vmatpush3.msra.mxu1 %v5629_v0 }
0x1578   :  { %4689 = vmatpush3.msra.mxu0 %v5638_v1  ;;  %4721 = vmatprep.subr.mxu1 %v4887_v17 }
0x1579   :  { %4690 = vmatprep.subr.mxu0 %v4887_v17  ;;  %4722 = vmatpush3.msra.mxu1 %v5638_v1 }
0x157a   :  { %4691 = vmatpush3.msra.mxu0 %v5647_v2  ;;  %4723 = vmatprep.subr.mxu1 %v4887_v17 }
0x157b   :  { %4693 = vmatmul.mubr.msk.f32.vlgmr.msra.gmra.mxu0 %vm418_vm2, %v3140_v52  ;;  %4724 = vmatpush3.msra.mxu1 %v5647_v2 }
0x157c   :  { %4725 = vmatprep.mubr.msk.f32.mxu1 %vm4888_vm3, %v4887_v17  ;;  %4706 = vmatprep.subr.mxu0 %v4887_v17 }
0x157d   :  { %4714 = vmatprep.mubr.msk.f32.mxu0 %vm4888_vm3, %v4887_v17  ;;  %4739 = vmatprep.subr.mxu1 %v4887_v17 }
0x157e   :  { %4707 = vmatpush3.msra.mxu0 %v3410_v42 }
0x157f   :  { %4708 = vmatprep.subr.mxu0 %v4887_v17 }
0x1580   :  { %4709 = vmatpush3.msra.mxu0 %v3409_v44 }
0x1581   :  { %4710 = vmatprep.subr.mxu0 %v4887_v17 }
0x160d   :  { %v3209_v12 = vpop.f32.mrf.mxu1 }
0x160e   :  { %v3213_v13 = vadd.f32 %v3209_v12, %v5133_v43 }
0x160f   :  { %v4683_v62 = vpop.f32.mrf.mxu1 }
0x1610   :  { %v3214_v0 = vmul.f32 %v3213_v13, %v5122_v30 }
0x1612   :  { %v4017_v1 = vmul.f32 -1.442695, %v3214_v0 }
0x1614   :  { %4855 = vpow2.f32 %v4017_v1 }
0x1621   :  { %v4856_v15 = vpop.eup %4855 }
0x1622   :  { %v3218_v2 = vadd.f32 1.0, %v4856_v15 }
0x1624   :  { %4857 = vrcp.f32 %v3218_v2 }
0x1631   :  { %v4858_v18 = vpop.eup %4857 }
0x1632   :  { %v3221_v16 = vmul.f32 %v4858_v18, %v5122_v30 }
0x1633   :  { %v3133_v55 = vpop.f32.mrf.mxu0  ;;  %v3376_v56 = vpop.f32.mrf.mxu1 }
0x1634   :  { %v5765_v57 = vadd.f32 %v3133_v55, %v5665_v22  ;;  %v3222_v58 = vsub.f32 %v3221_v16, %v5138_v47  ;;  %v3662_v55 = vld [vmem:[%s5895_s3 + $0xf8] sm:$0xff] }
0x1635   :  { %v4672_v19 = vpop.f32.mrf.mxu0  ;;  %v4705_v43 = vpop.f32.mrf.mxu1 }
0x1636   :  { %3225 = vrot.lane.b32.xlu1 %v3222_v58, %s4890_s28  ;;  %v3223_v36 = vmul.f32 %v3222_v58, %v5678_v46  ;;  %v3408_v46 = vld [vmem:[%s5895_s3 + $0xc8] sm:$0xff] }
0x1637   :  { %4711 = vmatpush3.msra.mxu0 %v3408_v46 }
0x1638   :  { %4712 = vmatprep.subr.mxu0 %v4887_v17 }
0x1639   :  { %4713 = vmatpush3.msra.mxu0 %v3407_v48 }
0x163a   :  { %4728 = vmatprep.subr.mxu0 %v4887_v17 }
0x163b   :  { %v3306_v21 = vpop.f32.mrf.mxu0 }
0x163c   :  { %v3307_v23 = vadd.f32 %v5772_v20, %v3306_v21  ;;  %v3749_v21 = vld [vmem:[%s5895_s3 + $0x120] sm:$0xff] }
0x163d   :  { %v4694_v24 = vpop.f32.mrf.mxu0 }
0x163e   :  { %v3380_v28 = vadd.f32 %v3376_v56, %v3307_v23  ;;  %v3659_v56 = vld [vmem:[%s5895_s3 + $0xe0] sm:$0xff]  ;;  %v3747_v23 = vld [vmem:[%s5895_s3 + $0x110] sm:$0xff]  ;;  %v3746_v24 = vld [vmem:[%s5895_s3 + $0x108] sm:$0xff] }
0x1640   :  { %v3381_v37 = vmul.f32 %v3380_v28, %v5122_v30  ;;  %v3832_v28 = vld [vmem:[%s5895_s3 + $0x148] sm:$0xff] }
0x1642   :  { %v4020_v22 = vmul.f32 -1.442695, %v3381_v37 }
0x1644   :  { %4859 = vpow2.f32 %v4020_v22  ;;  %v4026_v22 = vld [vmem:[%s5895_s3 + $0x100] ss:$0 sm:$0xff] }
0x1651   :  { %v4860_v29 = vpop.eup %4859 }
0x1652   :  { %v3385_v3 = vadd.f32 1.0, %v4860_v29 }
0x1654   :  { %4861 = vrcp.f32 %v3385_v3 }
0x1661   :  { %v4862_v31 = vpop.eup %4861 }
0x1662   :  { %v3388_v32 = vmul.f32 %v4862_v31, %v5122_v30 }
0x1664   :  { %v3389_v33 = vsub.f32 %v3388_v32, %v5138_v47 }
0x1666   :  { %3392 = vrot.lane.b32.xlu0 %v3389_v33, %s4890_s28  ;;  %v3390_v27 = vmul.f32 %v3389_v33, %v5683_v53 }
0x16a8   :  { %v3226_v41 = vpop.permute.xlu1 %3225 }
0x16a9   :  { %v3228_v39 = vmul.f32 %v3226_v41, %v3222_v58  ;;  %v3830_v41 = vld [vmem:[%s5895_s3 + $0x138] sm:$0xff] }
0x16ab   :  { %3230 = vrot.lane.b32.xlu1 %v3228_v39, %s4891_s29  ;;  %v3829_v39 = vld [vmem:[%s5895_s3 + $0x130] sm:$0xff] }
0x16d8   :  { %v3393_v35 = vpop.permute.xlu0 %3392 }
0x16d9   :  { %v3395_v25 = vmul.f32 %v3393_v35, %v3389_v33  ;;  %v4027_v35 = vld [vmem:[%s5895_s3 + $0x128] ss:$0 sm:$0xff] }
0x16db   :  { %3397 = vrot.lane.b32.xlu0 %v3395_v25, %s4891_s29 }
0x171d   :  { %v3231_v38 = vpop.permute.xlu1 %3230 }
0x171e   :  { %v3233_v26 = vadd.f32 %v3231_v38, %v3223_v36 }
0x1720   :  { %4863 = vtanh.f32 %v3233_v26 }
0x172d   :  { %v4864_v10 = vpop.eup %4863 }
0x172e   :  { %3236 = vrot.lane.b32.xlu1 %v4864_v10, %s4890_s28  ;;  %v4029_v10 = vld [vmem:[%s5895_s3 + $0x150] ss:$0 sm:$0xff] }
0x174d   :  { %v3398_v14 = vpop.permute.xlu0 %3397 }
0x174e   :  { %v3400_v34 = vadd.f32 %v3398_v14, %v3390_v27 }
0x1750   :  { %4865 = vtanh.f32 %v3400_v34 }
0x175d   :  { %v4866_v40 = vpop.eup %4865 }
0x175e   :  { %3403 = vrot.lane.b32.xlu0 %v4866_v40, %s4890_s28 }
0x17a0   :  { %v3237_v50 = vpop.permute.xlu1 %3236 }
0x17a1   :  { %v3239_v51 = vmul.f32 %v3237_v50, %v3222_v58 }
0x17a3   :  { %3488 = vrot.lane.b32.xlu1 %v3239_v51, %s4891_s29 }
0x17d0   :  { %v3404_v53 = vpop.permute.xlu0 %3403 }
0x17d1   :  { %v3406_v54 = vmul.f32 %v3404_v53, %v3389_v33  ;;  %v3831_v33 = vld [vmem:[%s5895_s3 + $0x140] sm:$0xff] }
0x17d3   :  { %3412 = vrot.lane.b32.xlu0 %v3406_v54, %s4891_s29 }
0x1815   :  { %v3489_v60 = vpop.permute.xlu1 %3488 }
0x1816   :  { %4726 = vmatmul.mubr.msk.f32.vlgmr.msra.gmra.mxu1 %vm418_vm2, %v3489_v60 }
0x1817   :  { %4747 = vmatprep.mubr.msk.f32.mxu1 %vm4888_vm3, %v4887_v17  ;;  %4740 = vmatpush3.msra.mxu1 %v3662_v55 }
0x1818   :  { %4741 = vmatprep.subr.mxu1 %v4887_v17 }
0x1845   :  { %v3413_v61 = vpop.permute.xlu0 %3412 }
0x1846   :  { %4715 = vmatmul.mubr.msk.f32.vlgmr.msra.gmra.mxu0 %vm418_vm2, %v3413_v61 }
0x1847   :  { %4729 = vmatpush3.msra.mxu0 %v5709_v7  ;;  %4736 = vmatprep.mubr.msk.f32.mxu0 %vm4888_vm3, %v4887_v17 }
0x1848   :  { %4730 = vmatprep.subr.mxu0 %v4887_v17 }
0x1849   :  { %4731 = vmatpush3.msra.mxu0 %v5718_v4 }
0x184a   :  { %4732 = vmatprep.subr.mxu0 %v4887_v17 }
0x184b   :  { %4733 = vmatpush3.msra.mxu0 %v5725_v8 }
0x184c   :  { %4734 = vmatprep.subr.mxu0 %v4887_v17 }
0x184d   :  { %4735 = vmatpush3.msra.mxu0 %v5732_v9 }
0x184e   :  { %4737 = vmatmul.mubr.msk.f32.vlgmr.msra.gmra.mxu0 %vm418_vm2, %v3413_v61  ;;  %4750 = vmatprep.subr.mxu0 %v4887_v17 }
0x184f   :  { %4758 = vmatprep.mubr.msk.f32.mxu0 %vm4888_vm3, %v4887_v17  ;;  %4751 = vmatpush3.msra.mxu0 %v3749_v21 }
0x1850   :  { %4752 = vmatprep.subr.mxu0 %v4887_v17 }
0x18d6   :  { %v3558_v63 = vpop.f32.mrf.mxu1 }
0x18d7   :  { %v3559_v45 = vadd.f32 %v5772_v20, %v3558_v63  ;;  %v3748_v20 = vld [vmem:[%s5895_s3 + $0x118] sm:$0xff] }
0x18d8   :  { %v4727_v5 = vpop.f32.mrf.mxu1  ;;  %4753 = vmatpush3.msra.mxu0 %v3748_v20 }
0x18d9   :  { %4754 = vmatprep.subr.mxu0 %v4887_v17 }
0x18da   :  { %4755 = vmatpush3.msra.mxu0 %v3747_v23 }
0x18db   :  { %4756 = vmatprep.subr.mxu0 %v4887_v17 }
0x18dc   :  { %4757 = vmatpush3.msra.mxu0 %v3746_v24 }
0x1906   :  { %v3482_v6 = vpop.f32.mrf.mxu0 }
0x1907   :  { %v3486_v59 = vadd.f32 %v3482_v6, %v5765_v57 }
0x1908   :  { %v4716_v49 = vpop.f32.mrf.mxu0 }
0x190e   :  { %v3628_v52 = vpop.f32.mrf.mxu0 }
0x190f   :  { %v3632_v7 = vadd.f32 %v3628_v52, %v3559_v45 }
0x1910   :  { %v4738_v4 = vpop.f32.mrf.mxu0 }
0x1911   :  { %v3633_v8 = vmul.f32 %v3632_v7, %v5122_v30 }
0x1913   :  { %v4024_v9 = vmul.f32 -1.442695, %v3633_v8 }
0x1915   :  { %4867 = vpow2.f32 %v4024_v9 }
0x1922   :  { %v4868_v11 = vpop.eup %4867 }
0x1923   :  { %v3637_v12 = vadd.f32 1.0, %v4868_v11 }
0x1925   :  { %4869 = vrcp.f32 %v3637_v12 }
0x1932   :  { %v4870_v13 = vpop.eup %4869 }
0x1933   :  { %v3640_v62 = vmul.f32 %v4870_v13, %v5122_v30  ;;  %v3661_v30 = vld [vmem:[%s5895_s3 + $0xf0] sm:$0xff] }
0x1934   :  { %4742 = vmatpush3.msra.mxu1 %v3661_v30 }
0x1935   :  { %v3641_v0 = vsub.f32 %v3640_v62, %v5138_v47  ;;  %v3660_v47 = vld [vmem:[%s5895_s3 + $0xe8] sm:$0xff]  ;;  %4743 = vmatprep.subr.mxu1 %v4887_v17 }
0x1936   :  { %4744 = vmatpush3.msra.mxu1 %v3660_v47 }
0x1937   :  { %3644 = vrot.lane.b32.xlu0 %v3641_v0, %s4890_s28  ;;  %v3642_v2 = vmul.f32 %v3641_v0, %v3400_v34  ;;  %4745 = vmatprep.subr.mxu1 %v4887_v17 }
0x1938   :  { %4746 = vmatpush3.msra.mxu1 %v3659_v56 }
0x1939   :  { %4761 = vmatprep.subr.mxu1 %v4887_v17 }
0x19a9   :  { %v3645_v1 = vpop.permute.xlu0 %3644 }
0x19aa   :  { %v3647_v15 = vmul.f32 %v3645_v1, %v3641_v0 }
0x19ac   :  { %3649 = vrot.lane.b32.xlu1 %v3647_v15, %s4891_s29 }
0x1a1e   :  { %v3650_v18 = vpop.permute.xlu1 %3649 }
0x1a1f   :  { %v3652_v16 = vadd.f32 %v3650_v18, %v3642_v2 }
0x1a21   :  { %4871 = vtanh.f32 %v3652_v16 }
0x1a2e   :  { %v4872_v57 = vpop.eup %4871 }
0x1a2f   :  { %3655 = vrot.lane.b32.xlu0 %v4872_v57, %s4890_s28 }
0x1aa1   :  { %v3656_v58 = vpop.permute.xlu0 %3655 }
0x1aa2   :  { %v3658_v19 = vmul.f32 %v3656_v58, %v3641_v0 }
0x1aa4   :  { %3664 = vrot.lane.b32.xlu1 %v3658_v19, %s4891_s29 }
0x1b16   :  { %v3665_v43 = vpop.permute.xlu1 %3664 }
0x1b17   :  { %4748 = vmatmul.mubr.msk.f32.vlgmr.msra.gmra.mxu1 %vm418_vm2, %v3665_v43 }
0x1b18   :  { %4769 = vmatprep.mubr.msk.f32.mxu1 %vm4888_vm3, %v4887_v17  ;;  %4762 = vmatpush3.msra.mxu1 %v3832_v28 }
0x1b19   :  { %4763 = vmatprep.subr.mxu1 %v4887_v17 }
0x1b1a   :  { %4764 = vmatpush3.msra.mxu1 %v3831_v33 }
0x1b1b   :  { %4765 = vmatprep.subr.mxu1 %v4887_v17 }
0x1b1c   :  { %4766 = vmatpush3.msra.mxu1 %v3830_v41 }
0x1b1d   :  { %4767 = vmatprep.subr.mxu1 %v4887_v17 }
0x1b1e   :  { %4768 = vmatpush3.msra.mxu1 %v3829_v39 }
0x1bd7   :  { %v3734_v37 = vpop.f32.mrf.mxu1 }
0x1bd8   :  { %v3738_v29 = vadd.f32 %v3734_v37, %v3486_v59 }
0x1bd9   :  { %v4749_v3 = vpop.f32.mrf.mxu1 }
0x1bda   :  { %v3744_v31 = vadd.f32 %v4026_v22, %v3738_v29 }
0x1bdc   :  { %v3745_v32 = vmax.f32 %v3744_v31, 0.0 }
0x1bde   :  { %4759 = vmatmul.mubr.msk.f32.vlgmr.msra.gmra.mxu0 %vm418_vm2, %v3745_v32 }
0x1c9e   :  { %v3824_v25 = vpop.f32.mrf.mxu0 }
0x1c9f   :  { %v3825_v36 = vadd.f32 %v4027_v35, %v3824_v25 }
0x1ca0   :  { %v4760_v38 = vpop.f32.mrf.mxu0 }
0x1ca1   :  { %v3828_v26 = vmax.f32 %v3825_v36, 0.0 }
0x1ca3   :  { %4770 = vmatmul.mubr.msk.f32.vlgmr.msra.gmra.mxu1 %vm418_vm2, %v3828_v26 }
0x1d63   :  { %v3907_v17 = vpop.f32.mrf.mxu1 }
0x1d64   :  { %v3908_v27 = vadd.f32 %v4029_v10, %v3907_v17 }
0x1d65   :  { %v4771_v14 = vpop.f32.mrf.mxu1 }
0x1d66   :  { %3912 = vst.msk [vmem:[%s5896_s4] sm:$0x3] %vm3911_vm7, %v3908_v27 }

</bundles_post_ra>
